<compile_context>
chip_gen: v5e
topology: v5e:2x2
jax: 0.10.0
libtpu: 0.0.40
codegen_flags: <defaults>
</compile_context>

<pallas_src>
import functools

import jax
import jax.numpy as jnp
from jax import lax
from jax.experimental import pallas as pl
from jax.experimental.pallas import tpu as pltpu


def _attention_kernel(x_ref, p_ref, out_ref, pad_ref, *,
                      height, width, images, cin, cr, pad, guard,
                      w2_off, small_off):
    # x_ref  : (B, Cin, HW)        input images, channel-major, lane-dense
    # p_ref  : (cr, PARAM_W)       packed params (w1_72 | w2_72 | b1 b2 w3 b3)
    # out_ref: (B, Cin, HW)
    # pad_ref: (cr, 2*G + B*PW)    per-image zero-padded activation scratch
    H, W = height, width
    HW = H * W
    P = pad                      # per-image pad (lanes), >= W+1, multiple of 128
    G = guard                    # global guard so tap slices never index OOB
    PW = HW + 2 * P              # padded slot width of one image
    B = images
    TOT = B * PW                 # padded output frame covering all images
    K = 9 * cr                   # im2col contraction depth

    # ---- packed parameters: static, lane-aligned slices of one VMEM block ----
    w1 = p_ref[0:cr, 0:K]                              # (cr, 9*cr)
    w2 = p_ref[0:cr, w2_off:w2_off + K]                # (cr, 9*cr)
    b1 = p_ref[0:cr, small_off + 0:small_off + 1]      # (cr, 1)
    b2 = p_ref[0:cr, small_off + 1:small_off + 2]      # (cr, 1)
    w3 = p_ref[0:cr, small_off + 2:small_off + 3]      # (cr, 1)
    b3 = p_ref[0:1, small_off + 3:small_off + 4]       # (1, 1)

    # ---- horizontal-tap validity masks over the padded frame (hoisted once) ----
    lane = lax.broadcasted_iota(jnp.int32, (1, TOT), 1)
    col = ((lane % PW) - P) % W          # within-image column (junk on pad lanes, unused)
    m_left = (col >= 1).astype(jnp.float32)       # source col x-1 is valid
    m_right = (col <= W - 2).astype(jnp.float32)  # source col x+1 is valid

    # Zero the padded scratch (tiny: cr x (TOT+2G) f32).  Done every grid step so
    # the pad strips / guards are provably zero and the kernel stays megacore-safe
    # on v7x (each core owns its scratch instance); interiors get overwritten below.
    pad_ref[...] = jnp.zeros_like(pad_ref)

    def conv3x3_relu(w72, b):
        # Single fused im2col matmul per conv layer: 9 shifted (cr, TOT) tap
        # slices of the padded scratch are stacked along the sublane axis into a
        # (9*cr, TOT) matrix and contracted in ONE MXU dot (K = 9*cr) instead of
        # 9 tiny accumulated dots.  Vertical overflow lands in the zero pad
        # strips by construction; horizontal overflow is masked per column.
        taps = []
        for dy in range(3):
            for dx in range(3):
                off = (dy - 1) * W + (dx - 1)
                t = pad_ref[:, G + off:G + off + TOT]
                if dx == 0:
                    t = t * m_left
                elif dx == 2:
                    t = t * m_right
                taps.append(t)
        col_mat = jnp.concatenate(taps, axis=0)          # (9*cr, TOT)
        acc = jnp.dot(w72, col_mat, preferred_element_type=jnp.float32)
        return jnp.maximum(acc + b, 0.0)                 # (cr, TOT)

    # ---- load the input block and scatter interiors into the padded frame ----
    x3 = x_ref[...].astype(jnp.float32)                  # (B, Cin, HW)
    for i in range(B):
        base = G + i * PW + P                            # 128-aligned interior start
        pad_ref[0:cin, base:base + HW] = x3[i]

    h1 = conv3x3_relu(w1, b1)                            # conv1 3x3 + ReLU
    for i in range(B):                                   # write interiors back;
        base = G + i * PW + P                            # pad strips stay zero
        pad_ref[:, base:base + HW] = h1[:, i * PW + P:i * PW + P + HW]

    h2 = conv3x3_relu(w2, b2)                            # conv2 3x3 + ReLU

    # conv3 (1x1 -> 1 channel) + Sigmoid: VPU multiply + cross-sublane reduce,
    # avoiding an M=1 MXU matmul and any relayout before the gating broadcast.
    gate = jax.nn.sigmoid(jnp.sum(h2 * w3, axis=0, keepdims=True) + b3)   # (1, TOT)

    # ---- gate the input and store, one lane-dense (Cin, HW) slab per image ----
    for i in range(B):
        a_i = gate[:, i * PW + P:i * PW + P + HW]        # (1, HW), aligned slice
        out_ref[i] = (x3[i] * a_i).astype(out_ref.dtype)


def _pack_params(params, cin, cout, cr, w2_off, small_off, param_w):
    """Pack HWIO conv weights + biases into one (cr, param_w) f32 block.

    Layout: cols [0, 9*cr)            = conv1 im2col weights (cr x 9*cr)
            cols [w2_off, w2_off+9cr) = conv2 im2col weights
            col  small_off + 0/1/2    = b1 / b2 / w3   (one value per out channel)
            col  small_off + 3, row 0 = b3 (scalar)
    im2col weight column index = cr * (3*dy + dx) + in_channel, matching the
    sublane order in which the kernel stacks the 9 taps.
    """
    w1, b1, w2, b2, w3, b3 = params

    def im2col_weight(w_hwio, c_in):
        wp = jnp.zeros((3, 3, cr, cr), jnp.float32)
        wp = wp.at[:, :, :c_in, :cout].set(w_hwio.astype(jnp.float32))
        return wp.reshape(9 * cr, cr).T                  # (cr, 9*cr)

    p = jnp.zeros((cr, param_w), jnp.float32)
    p = p.at[:, 0:9 * cr].set(im2col_weight(w1, cin))
    p = p.at[:, w2_off:w2_off + 9 * cr].set(im2col_weight(w2, cout))
    p = p.at[:cout, small_off + 0].set(b1.astype(jnp.float32))
    p = p.at[:cout, small_off + 1].set(b2.astype(jnp.float32))
    p = p.at[:cout, small_off + 2].set(w3.astype(jnp.float32))
    p = p.at[0, small_off + 3].set(b3.astype(jnp.float32))
    return p


def attention_module_nchw(x_nchw, params, images_per_step=None):
    """PyTorch-compatible forward (NCHW in, NCHW out).

    images_per_step: how many images are stacked along the lane axis per grid
    step.  Default = whole batch in one step (best on single-TC v5e/v6e).  On
    v7x, images_per_step = N // 2 gives each TensorCore exactly one step.
    """
    n, cin, h, w = x_nchw.shape
    hw = h * w
    cout = params[0].shape[3]
    cr = ((max(cin, cout) + 7) // 8) * 8        # channel rows, sublane-tile padded
    assert cin <= cr and cout <= cr

    P = 128                                     # per-image lane pad (aligned)
    G = 128                                     # global guard for tap slices
    assert w + 1 <= P and w + 1 <= G, "image width too large for fixed pad"
    pw = hw + 2 * P

    b_blk = n if images_per_step is None else images_per_step
    assert n % b_blk == 0
    n_steps = n // b_blk
    tot = b_blk * pw
    buf_w = tot + 2 * G

    k = 9 * cr
    w2_off = ((k + 127) // 128) * 128
    small_off = ((w2_off + k + 127) // 128) * 128
    param_w = small_off + 128

    p_packed = _pack_params(params, cin, cout, cr, w2_off, small_off, param_w)
    x_flat = x_nchw.reshape(n, cin, hw)         # free reshape, stays NCHW-major

    kernel = functools.partial(
        _attention_kernel, height=h, width=w, images=b_blk, cin=cin, cr=cr,
        pad=P, guard=G, w2_off=w2_off, small_off=small_off)

    y_flat = pl.pallas_call(
        kernel,
        out_shape=jax.ShapeDtypeStruct((n, cin, hw), x_nchw.dtype),
        grid_spec=pltpu.PrefetchScalarGridSpec(
            num_scalar_prefetch=0,
            grid=(n_steps,),
            in_specs=[
                pl.BlockSpec((b_blk, cin, hw), lambda i: (i, 0, 0)),
                pl.BlockSpec((cr, param_w), lambda i: (0, 0)),
            ],
            out_specs=pl.BlockSpec((b_blk, cin, hw), lambda i: (i, 0, 0)),
            scratch_shapes=[pltpu.VMEM((cr, buf_w), jnp.float32)],
        ),
        compiler_params=pltpu.CompilerParams(
            dimension_semantics=("parallel",)),
    )(x_flat, p_packed)

    return y_flat.reshape(n, cin, h, w)


def init_params(key, in_channels, out_channels, dtype=jnp.float32):
    """Deterministic synthetic parameters (HWIO conv weights, vector biases)."""
    k1, k2, k3, k4, k5, k6 = jax.random.split(key, 6)
    w1 = 0.1 * jax.random.normal(k1, (3, 3, in_channels, out_channels), dtype)
    b1 = 0.1 * jax.random.normal(k2, (out_channels,), dtype)
    w2 = 0.1 * jax.random.normal(k3, (3, 3, out_channels, out_channels), dtype)
    b2 = 0.1 * jax.random.normal(k4, (out_channels,), dtype)
    w3 = 0.1 * jax.random.normal(k5, (out_channels,), dtype)
    b3 = 0.1 * jax.random.normal(k6, (), dtype)
    return (w1, b1, w2, b2, w3, b3)


def reference_nchw(x_nchw, params):
    """Pure-JAX reference of the PyTorch forward pass (NCHW in/out)."""
    w1, b1, w2, b2, w3, b3 = params
    x = jnp.transpose(x_nchw, (0, 2, 3, 1))                      # NHWC
    dn1 = lax.conv_dimension_numbers(x.shape, w1.shape, ('NHWC', 'HWIO', 'NHWC'))
    h1 = lax.conv_general_dilated(x, w1, (1, 1), 'SAME', dimension_numbers=dn1)
    h1 = jnp.maximum(h1 + b1, 0.0)
    dn2 = lax.conv_dimension_numbers(h1.shape, w2.shape, ('NHWC', 'HWIO', 'NHWC'))
    h2 = lax.conv_general_dilated(h1, w2, (1, 1), 'SAME', dimension_numbers=dn2)
    h2 = jnp.maximum(h2 + b2, 0.0)
    a = jax.nn.sigmoid(jnp.einsum('nhwc,c->nhw', h2, w3)[..., None] + b3)
    y = x * a
    return jnp.transpose(y, (0, 3, 1, 2))


if __name__ == "__main__":
    key = jax.random.PRNGKey(0)
    k_x, k_p = jax.random.split(key)

    N, Cin, H, W = 2, 4, 16, 16     # NCHW, like the PyTorch module input
    Cout = 8                        # out_channels

    x = jax.random.normal(k_x, (N, Cin, H, W), jnp.float32)
    params = init_params(k_p, Cin, Cout)

    y = attention_module_nchw(x, params)    # single grid step, whole batch stacked
    y = jax.block_until_ready(y)

    # correctness check against a pure-JAX reference of the PyTorch forward
    y_ref = reference_nchw(x, params)
    assert y.shape == x.shape
    assert jnp.allclose(y, y_ref, atol=1e-4, rtol=1e-4), "mismatch vs reference"

    print("KERNEL_OK")
</pallas_src>

<mosaic_0001>
module attributes {stable_mosaic.version = 11 : i64} {
  func.func @_attention_kernel(%arg0: i32, %arg1: memref<2x4x256xf32, #tpu.memory_space<vmem>>, %arg2: memref<8x384xf32, #tpu.memory_space<vmem>>, %arg3: memref<2x4x256xf32, #tpu.memory_space<vmem>>, %arg4: memref<8x1280xf32, #tpu.memory_space<vmem>>) attributes {dimension_semantics = [#tpu.dimension_semantics<parallel>], iteration_bounds = array<i64: 1>, scalar_prefetch = 0 : i64, scratch_operands = 1 : i64, tpu.core_type = #tpu.core_type<tc>, window_params = [{transform_indices = @transform_0, window_bounds = array<i64: 2, 4, 256>}, {pipeline_mode = #tpu.pipeline_mode<synchronous>, transform_indices = @transform_1, window_bounds = array<i64: 8, 384>}, {transform_indices = @transform_2, window_bounds = array<i64: 2, 4, 256>}]} {
    %c0 = arith.constant 0 : index
    %c0_0 = arith.constant 0 : index
    %0 = vector.load %arg2[%c0, %c0_0] : memref<8x384xf32, #tpu.memory_space<vmem>>, vector<8x72xf32>
    %c0_1 = arith.constant 0 : index
    %c128 = arith.constant 128 : index
    %1 = vector.load %arg2[%c0_1, %c128] : memref<8x384xf32, #tpu.memory_space<vmem>>, vector<8x72xf32>
    %c0_2 = arith.constant 0 : index
    %c256 = arith.constant 256 : index
    %2 = vector.load %arg2[%c0_2, %c256] : memref<8x384xf32, #tpu.memory_space<vmem>>, vector<8x1xf32>
    %c0_3 = arith.constant 0 : index
    %c257 = arith.constant 257 : index
    %3 = vector.load %arg2[%c0_3, %c257] : memref<8x384xf32, #tpu.memory_space<vmem>>, vector<8x1xf32>
    %c0_4 = arith.constant 0 : index
    %c258 = arith.constant 258 : index
    %4 = vector.load %arg2[%c0_4, %c258] : memref<8x384xf32, #tpu.memory_space<vmem>>, vector<8x1xf32>
    %c0_5 = arith.constant 0 : index
    %c259 = arith.constant 259 : index
    %5 = vector.load %arg2[%c0_5, %c259] : memref<8x384xf32, #tpu.memory_space<vmem>>, vector<1x1xf32>
    %6 = tpu.iota {dimensions = array<i32: 1>} : vector<1x1024xi32>
    %c512_i32 = arith.constant 512 : i32
    %c0_i32 = arith.constant 0 : i32
    %7 = arith.cmpi eq, %c512_i32, %c0_i32 : i32
    %c1_i32 = arith.constant 1 : i32
    %8 = arith.select %7, %c1_i32, %c512_i32 : i32
    %9 = vector.broadcast %8 : i32 to vector<1x1024xi32>
    %10 = arith.remsi %6, %9 : vector<1x1024xi32>
    %c0_i32_6 = arith.constant 0 : i32
    %11 = vector.broadcast %c0_i32_6 : i32 to vector<1x1024xi32>
    %12 = arith.cmpi ne, %10, %11 : vector<1x1024xi32>
    %c0_i32_7 = arith.constant 0 : i32
    %13 = vector.broadcast %c0_i32_7 : i32 to vector<1x1024xi32>
    %14 = arith.cmpi slt, %10, %13 : vector<1x1024xi32>
    %c0_i32_8 = arith.constant 0 : i32
    %15 = arith.cmpi slt, %8, %c0_i32_8 : i32
    %16 = vector.broadcast %15 : i1 to vector<1x1024xi1>
    %17 = vector.broadcast %16 : vector<1x1024xi1> to vector<1x1024xi1>
    %18 = arith.xori %14, %17 : vector<1x1024xi1>
    %19 = arith.andi %18, %12 : vector<1x1024xi1>
    %20 = vector.broadcast %8 : i32 to vector<1x1024xi32>
    %21 = arith.addi %10, %20 : vector<1x1024xi32>
    %22 = arith.select %19, %21, %10 : vector<1x1024xi1>, vector<1x1024xi32>
    %c128_i32 = arith.constant 128 : i32
    %23 = vector.broadcast %c128_i32 : i32 to vector<1x1024xi32>
    %24 = arith.subi %22, %23 : vector<1x1024xi32>
    %c16_i32 = arith.constant 16 : i32
    %c0_i32_9 = arith.constant 0 : i32
    %25 = arith.cmpi eq, %c16_i32, %c0_i32_9 : i32
    %c1_i32_10 = arith.constant 1 : i32
    %26 = arith.select %25, %c1_i32_10, %c16_i32 : i32
    %27 = vector.broadcast %26 : i32 to vector<1x1024xi32>
    %28 = arith.remsi %24, %27 : vector<1x1024xi32>
    %c0_i32_11 = arith.constant 0 : i32
    %29 = vector.broadcast %c0_i32_11 : i32 to vector<1x1024xi32>
    %30 = arith.cmpi ne, %28, %29 : vector<1x1024xi32>
    %c0_i32_12 = arith.constant 0 : i32
    %31 = vector.broadcast %c0_i32_12 : i32 to vector<1x1024xi32>
    %32 = arith.cmpi slt, %28, %31 : vector<1x1024xi32>
    %c0_i32_13 = arith.constant 0 : i32
    %33 = arith.cmpi slt, %26, %c0_i32_13 : i32
    %34 = vector.broadcast %33 : i1 to vector<1x1024xi1>
    %35 = vector.broadcast %34 : vector<1x1024xi1> to vector<1x1024xi1>
    %36 = arith.xori %32, %35 : vector<1x1024xi1>
    %37 = arith.andi %36, %30 : vector<1x1024xi1>
    %38 = vector.broadcast %26 : i32 to vector<1x1024xi32>
    %39 = arith.addi %28, %38 : vector<1x1024xi32>
    %40 = arith.select %37, %39, %28 : vector<1x1024xi1>, vector<1x1024xi32>
    %c1_i32_14 = arith.constant 1 : i32
    %41 = vector.broadcast %c1_i32_14 : i32 to vector<1x1024xi32>
    %42 = arith.cmpi sge, %40, %41 : vector<1x1024xi32>
    %43 = arith.extui %42 : vector<1x1024xi1> to vector<1x1024xi32>
    %44 = arith.sitofp %43 : vector<1x1024xi32> to vector<1x1024xf32>
    %c14_i32 = arith.constant 14 : i32
    %45 = vector.broadcast %c14_i32 : i32 to vector<1x1024xi32>
    %46 = arith.cmpi sle, %40, %45 : vector<1x1024xi32>
    %47 = arith.extui %46 : vector<1x1024xi1> to vector<1x1024xi32>
    %48 = arith.sitofp %47 : vector<1x1024xi32> to vector<1x1024xf32>
    %cst = arith.constant 0.000000e+00 : f32
    %49 = vector.broadcast %cst : f32 to vector<8x1280xf32>
    %c0_15 = arith.constant 0 : index
    %c0_16 = arith.constant 0 : index
    %50 = vector.load %arg4[%c0_15, %c0_16] : memref<8x1280xf32, #tpu.memory_space<vmem>>, vector<8x1280xf32>
    tpu.vector_store %arg4[%c0_15, %c0_16], %49 {strides = array<i32>} : memref<8x1280xf32, #tpu.memory_space<vmem>>, vector<8x1280xf32>,
    %c0_17 = arith.constant 0 : index
    %c0_18 = arith.constant 0 : index
    %c0_19 = arith.constant 0 : index
    %51 = vector.load %arg1[%c0_17, %c0_18, %c0_19] : memref<2x4x256xf32, #tpu.memory_space<vmem>>, vector<2x4x256xf32>
    %52 = vector.extract_strided_slice %51 {offsets = [0, 0, 0], sizes = [1, 4, 256], strides = [1, 1, 1]} : vector<2x4x256xf32> to vector<1x4x256xf32>
    %53 = vector.shape_cast %52 : vector<1x4x256xf32> to vector<4x256xf32>
    %c0_20 = arith.constant 0 : index
    %c256_21 = arith.constant 256 : index
    %54 = vector.load %arg4[%c0_20, %c256_21] : memref<8x1280xf32, #tpu.memory_space<vmem>>, vector<4x256xf32>
    tpu.vector_store %arg4[%c0_20, %c256_21], %53 {strides = array<i32>} : memref<8x1280xf32, #tpu.memory_space<vmem>>, vector<4x256xf32>,
    %55 = vector.extract_strided_slice %51 {offsets = [1, 0, 0], sizes = [1, 4, 256], strides = [1, 1, 1]} : vector<2x4x256xf32> to vector<1x4x256xf32>
    %56 = vector.shape_cast %55 : vector<1x4x256xf32> to vector<4x256xf32>
    %c0_22 = arith.constant 0 : index
    %c768 = arith.constant 768 : index
    %57 = vector.load %arg4[%c0_22, %c768] : memref<8x1280xf32, #tpu.memory_space<vmem>>, vector<4x256xf32>
    tpu.vector_store %arg4[%c0_22, %c768], %56 {strides = array<i32>} : memref<8x1280xf32, #tpu.memory_space<vmem>>, vector<4x256xf32>,
    %c0_23 = arith.constant 0 : index
    %c111 = arith.constant 111 : index
    %58 = vector.load %arg4[%c0_23, %c111] : memref<8x1280xf32, #tpu.memory_space<vmem>>, vector<8x1024xf32>
    %59 = vector.broadcast %44 : vector<1x1024xf32> to vector<8x1024xf32>
    %60 = arith.mulf %58, %59 : vector<8x1024xf32>
    %c0_24 = arith.constant 0 : index
    %c112 = arith.constant 112 : index
    %61 = vector.load %arg4[%c0_24, %c112] : memref<8x1280xf32, #tpu.memory_space<vmem>>, vector<8x1024xf32>
    %c0_25 = arith.constant 0 : index
    %c113 = arith.constant 113 : index
    %62 = vector.load %arg4[%c0_25, %c113] : memref<8x1280xf32, #tpu.memory_space<vmem>>, vector<8x1024xf32>
    %63 = vector.broadcast %48 : vector<1x1024xf32> to vector<8x1024xf32>
    %64 = arith.mulf %62, %63 : vector<8x1024xf32>
    %c0_26 = arith.constant 0 : index
    %c127 = arith.constant 127 : index
    %65 = vector.load %arg4[%c0_26, %c127] : memref<8x1280xf32, #tpu.memory_space<vmem>>, vector<8x1024xf32>
    %66 = vector.broadcast %44 : vector<1x1024xf32> to vector<8x1024xf32>
    %67 = arith.mulf %65, %66 : vector<8x1024xf32>
    %c0_27 = arith.constant 0 : index
    %c128_28 = arith.constant 128 : index
    %68 = vector.load %arg4[%c0_27, %c128_28] : memref<8x1280xf32, #tpu.memory_space<vmem>>, vector<8x1024xf32>
    %c0_29 = arith.constant 0 : index
    %c129 = arith.constant 129 : index
    %69 = vector.load %arg4[%c0_29, %c129] : memref<8x1280xf32, #tpu.memory_space<vmem>>, vector<8x1024xf32>
    %70 = vector.broadcast %48 : vector<1x1024xf32> to vector<8x1024xf32>
    %71 = arith.mulf %69, %70 : vector<8x1024xf32>
    %c0_30 = arith.constant 0 : index
    %c143 = arith.constant 143 : index
    %72 = vector.load %arg4[%c0_30, %c143] : memref<8x1280xf32, #tpu.memory_space<vmem>>, vector<8x1024xf32>
    %73 = vector.broadcast %44 : vector<1x1024xf32> to vector<8x1024xf32>
    %74 = arith.mulf %72, %73 : vector<8x1024xf32>
    %c0_31 = arith.constant 0 : index
    %c144 = arith.constant 144 : index
    %75 = vector.load %arg4[%c0_31, %c144] : memref<8x1280xf32, #tpu.memory_space<vmem>>, vector<8x1024xf32>
    %c0_32 = arith.constant 0 : index
    %c145 = arith.constant 145 : index
    %76 = vector.load %arg4[%c0_32, %c145] : memref<8x1280xf32, #tpu.memory_space<vmem>>, vector<8x1024xf32>
    %77 = vector.broadcast %48 : vector<1x1024xf32> to vector<8x1024xf32>
    %78 = arith.mulf %76, %77 : vector<8x1024xf32>
    %79 = tpu.concatenate %60, %61, %64, %67, %68, %71, %74, %75, %78 in 0 : vector<8x1024xf32>, vector<8x1024xf32>, vector<8x1024xf32>, vector<8x1024xf32>, vector<8x1024xf32>, vector<8x1024xf32>, vector<8x1024xf32>, vector<8x1024xf32>, vector<8x1024xf32> -> vector<72x1024xf32>
    %cst_33 = arith.constant dense<0.000000e+00> : vector<8x1024xf32>
    %80 = tpu.matmul %0, %79, %cst_33 {dimension_numbers = #tpu.dot_dimension_numbers<[1], [0], [0], [1], [0, 0, 1, 1], [], []>} : vector<8x72xf32>, vector<72x1024xf32>, vector<8x1024xf32> -> vector<8x1024xf32>
    %81 = vector.broadcast %2 : vector<8x1xf32> to vector<8x1024xf32>
    %82 = arith.addf %80, %81 : vector<8x1024xf32>
    %cst_34 = arith.constant 0.000000e+00 : f32
    %83 = vector.broadcast %cst_34 : f32 to vector<8x1024xf32>
    %84 = arith.maximumf %82, %83 : vector<8x1024xf32>
    %85 = vector.extract_strided_slice %84 {offsets = [0, 128], sizes = [8, 256], strides = [1, 1]} : vector<8x1024xf32> to vector<8x256xf32>
    %c0_35 = arith.constant 0 : index
    %c256_36 = arith.constant 256 : index
    %86 = vector.load %arg4[%c0_35, %c256_36] : memref<8x1280xf32, #tpu.memory_space<vmem>>, vector<8x256xf32>
    tpu.vector_store %arg4[%c0_35, %c256_36], %85 {strides = array<i32>} : memref<8x1280xf32, #tpu.memory_space<vmem>>, vector<8x256xf32>,
    %87 = vector.extract_strided_slice %84 {offsets = [0, 640], sizes = [8, 256], strides = [1, 1]} : vector<8x1024xf32> to vector<8x256xf32>
    %c0_37 = arith.constant 0 : index
    %c768_38 = arith.constant 768 : index
    %88 = vector.load %arg4[%c0_37, %c768_38] : memref<8x1280xf32, #tpu.memory_space<vmem>>, vector<8x256xf32>
    tpu.vector_store %arg4[%c0_37, %c768_38], %87 {strides = array<i32>} : memref<8x1280xf32, #tpu.memory_space<vmem>>, vector<8x256xf32>,
    %c0_39 = arith.constant 0 : index
    %c111_40 = arith.constant 111 : index
    %89 = vector.load %arg4[%c0_39, %c111_40] : memref<8x1280xf32, #tpu.memory_space<vmem>>, vector<8x1024xf32>
    %90 = vector.broadcast %44 : vector<1x1024xf32> to vector<8x1024xf32>
    %91 = arith.mulf %89, %90 : vector<8x1024xf32>
    %c0_41 = arith.constant 0 : index
    %c112_42 = arith.constant 112 : index
    %92 = vector.load %arg4[%c0_41, %c112_42] : memref<8x1280xf32, #tpu.memory_space<vmem>>, vector<8x1024xf32>
    %c0_43 = arith.constant 0 : index
    %c113_44 = arith.constant 113 : index
    %93 = vector.load %arg4[%c0_43, %c113_44] : memref<8x1280xf32, #tpu.memory_space<vmem>>, vector<8x1024xf32>
    %94 = vector.broadcast %48 : vector<1x1024xf32> to vector<8x1024xf32>
    %95 = arith.mulf %93, %94 : vector<8x1024xf32>
    %c0_45 = arith.constant 0 : index
    %c127_46 = arith.constant 127 : index
    %96 = vector.load %arg4[%c0_45, %c127_46] : memref<8x1280xf32, #tpu.memory_space<vmem>>, vector<8x1024xf32>
    %97 = vector.broadcast %44 : vector<1x1024xf32> to vector<8x1024xf32>
    %98 = arith.mulf %96, %97 : vector<8x1024xf32>
    %c0_47 = arith.constant 0 : index
    %c128_48 = arith.constant 128 : index
    %99 = vector.load %arg4[%c0_47, %c128_48] : memref<8x1280xf32, #tpu.memory_space<vmem>>, vector<8x1024xf32>
    %c0_49 = arith.constant 0 : index
    %c129_50 = arith.constant 129 : index
    %100 = vector.load %arg4[%c0_49, %c129_50] : memref<8x1280xf32, #tpu.memory_space<vmem>>, vector<8x1024xf32>
    %101 = vector.broadcast %48 : vector<1x1024xf32> to vector<8x1024xf32>
    %102 = arith.mulf %100, %101 : vector<8x1024xf32>
    %c0_51 = arith.constant 0 : index
    %c143_52 = arith.constant 143 : index
    %103 = vector.load %arg4[%c0_51, %c143_52] : memref<8x1280xf32, #tpu.memory_space<vmem>>, vector<8x1024xf32>
    %104 = vector.broadcast %44 : vector<1x1024xf32> to vector<8x1024xf32>
    %105 = arith.mulf %103, %104 : vector<8x1024xf32>
    %c0_53 = arith.constant 0 : index
    %c144_54 = arith.constant 144 : index
    %106 = vector.load %arg4[%c0_53, %c144_54] : memref<8x1280xf32, #tpu.memory_space<vmem>>, vector<8x1024xf32>
    %c0_55 = arith.constant 0 : index
    %c145_56 = arith.constant 145 : index
    %107 = vector.load %arg4[%c0_55, %c145_56] : memref<8x1280xf32, #tpu.memory_space<vmem>>, vector<8x1024xf32>
    %108 = vector.broadcast %48 : vector<1x1024xf32> to vector<8x1024xf32>
    %109 = arith.mulf %107, %108 : vector<8x1024xf32>
    %110 = tpu.concatenate %91, %92, %95, %98, %99, %102, %105, %106, %109 in 0 : vector<8x1024xf32>, vector<8x1024xf32>, vector<8x1024xf32>, vector<8x1024xf32>, vector<8x1024xf32>, vector<8x1024xf32>, vector<8x1024xf32>, vector<8x1024xf32>, vector<8x1024xf32> -> vector<72x1024xf32>
    %cst_57 = arith.constant dense<0.000000e+00> : vector<8x1024xf32>
    %111 = tpu.matmul %1, %110, %cst_57 {dimension_numbers = #tpu.dot_dimension_numbers<[1], [0], [0], [1], [0, 0, 1, 1], [], []>} : vector<8x72xf32>, vector<72x1024xf32>, vector<8x1024xf32> -> vector<8x1024xf32>
    %112 = vector.broadcast %3 : vector<8x1xf32> to vector<8x1024xf32>
    %113 = arith.addf %111, %112 : vector<8x1024xf32>
    %cst_58 = arith.constant 0.000000e+00 : f32
    %114 = vector.broadcast %cst_58 : f32 to vector<8x1024xf32>
    %115 = arith.maximumf %113, %114 : vector<8x1024xf32>
    %116 = vector.broadcast %4 : vector<8x1xf32> to vector<8x1024xf32>
    %117 = arith.mulf %115, %116 : vector<8x1024xf32>
    %cst_59 = arith.constant dense<0.000000e+00> : vector<1024xf32>
    %118 = vector.multi_reduction <add>, %117, %cst_59 [0] : vector<8x1024xf32> to vector<1024xf32>
    %119 = vector.shape_cast %118 : vector<1024xf32> to vector<1x1024xf32>
    %120 = vector.broadcast %5 : vector<1x1xf32> to vector<1x1024xf32>
    %121 = arith.addf %119, %120 : vector<1x1024xf32>
    %122 = arith.negf %121 : vector<1x1024xf32>
    %123 = math.exp %122 : vector<1x1024xf32>
    %cst_60 = arith.constant 1.000000e+00 : f32
    %124 = vector.broadcast %cst_60 : f32 to vector<1x1024xf32>
    %125 = arith.addf %124, %123 : vector<1x1024xf32>
    %126 = arith.divf %124, %125 : vector<1x1024xf32>
    %127 = vector.extract_strided_slice %126 {offsets = [0, 128], sizes = [1, 256], strides = [1, 1]} : vector<1x1024xf32> to vector<1x256xf32>
    %128 = vector.extract_strided_slice %51 {offsets = [0, 0, 0], sizes = [1, 4, 256], strides = [1, 1, 1]} : vector<2x4x256xf32> to vector<1x4x256xf32>
    %129 = vector.shape_cast %128 : vector<1x4x256xf32> to vector<4x256xf32>
    %130 = vector.broadcast %127 : vector<1x256xf32> to vector<4x256xf32>
    %131 = arith.mulf %129, %130 : vector<4x256xf32>
    %c0_61 = arith.constant 0 : index
    %c0_62 = arith.constant 0 : index
    %c0_63 = arith.constant 0 : index
    %132 = vector.load %arg3[%c0_61, %c0_62, %c0_63] : memref<2x4x256xf32, #tpu.memory_space<vmem>>, vector<1x4x256xf32>
    %133 = vector.shape_cast %132 : vector<1x4x256xf32> to vector<4x256xf32>
    %134 = vector.shape_cast %131 : vector<4x256xf32> to vector<1x4x256xf32>
    tpu.vector_store %arg3[%c0_61, %c0_62, %c0_63], %134 {strides = array<i32>} : memref<2x4x256xf32, #tpu.memory_space<vmem>>, vector<1x4x256xf32>,
    %135 = vector.extract_strided_slice %126 {offsets = [0, 640], sizes = [1, 256], strides = [1, 1]} : vector<1x1024xf32> to vector<1x256xf32>
    %136 = vector.extract_strided_slice %51 {offsets = [1, 0, 0], sizes = [1, 4, 256], strides = [1, 1, 1]} : vector<2x4x256xf32> to vector<1x4x256xf32>
    %137 = vector.shape_cast %136 : vector<1x4x256xf32> to vector<4x256xf32>
    %138 = vector.broadcast %135 : vector<1x256xf32> to vector<4x256xf32>
    %139 = arith.mulf %137, %138 : vector<4x256xf32>
    %c1 = arith.constant 1 : index
    %c0_64 = arith.constant 0 : index
    %c0_65 = arith.constant 0 : index
    %140 = vector.load %arg3[%c1, %c0_64, %c0_65] : memref<2x4x256xf32, #tpu.memory_space<vmem>>, vector<1x4x256xf32>
    %141 = vector.shape_cast %140 : vector<1x4x256xf32> to vector<4x256xf32>
    %142 = vector.shape_cast %139 : vector<4x256xf32> to vector<1x4x256xf32>
    tpu.vector_store %arg3[%c1, %c0_64, %c0_65], %142 {strides = array<i32>} : memref<2x4x256xf32, #tpu.memory_space<vmem>>, vector<1x4x256xf32>,
    return
  }
  func.func @transform_0(%arg0: i32) -> (i32, i32, i32) {
    %c0_i32 = arith.constant 0 : i32
    %c0_i32_0 = arith.constant 0 : i32
    %c0_i32_1 = arith.constant 0 : i32
    return %arg0, %c0_i32, %c0_i32_0 : i32, i32, i32
  }
  func.func @transform_1(%arg0: i32) -> (i32, i32) {
    %c0_i32 = arith.constant 0 : i32
    %c0_i32_0 = arith.constant 0 : i32
    %c0_i32_1 = arith.constant 0 : i32
    return %c0_i32, %c0_i32_0 : i32, i32
  }
  func.func @transform_2(%arg0: i32) -> (i32, i32, i32) {
    %c0_i32 = arith.constant 0 : i32
    %c0_i32_0 = arith.constant 0 : i32
    %c0_i32_1 = arith.constant 0 : i32
    return %arg0, %c0_i32, %c0_i32_0 : i32, i32, i32
  }
}

</mosaic_0001>

<bundles_post_ra>
// kernel: tpu_custom_call.1
= control target key start
LH: loop header
LB: loop body
LE: loop exit
PB: predicated region body
PF: predicated region fallthrough
CT: control target
= control target key end

     0   :  { %7 = vsyncpa [#allocation4], 0  ;;  %s3992_s0 = inlined_call_operand.hbm [shape: f32[2,4,256], index: 0, kind: input, shape index: {}]   ;;  %s3993_s1 = inlined_call_operand.hbm [shape: f32[8,384], index: 1, kind: input, shape index: {}]   ;;  %s3994_s2 = inlined_call_operand.hbm [shape: f32[2,4,256], index: 2, kind: output, shape index: {}]  }
   0x1   :  { %8 = vsyncpa [#allocation7], 0 }
   0x2   :  { %9 = vsyncpa [#allocation5], 0  ;;  %s14_s11 = sshll.u32 %s3992_s0, 4  ;;  %s2712_s12 = smov [#allocation3]   ;;  %s15_s11 = int_to_ptr.hbm [resolvable:$true] %s14_s11 }
   0x3   :  { %s16_s13 = sshll.u32 %s2712_s12, 4  ;;  %s28_s16 = sshll.u32 %s3993_s1, 4  ;;  %s17_s13 = int_to_ptr.vmem [resolvable:$true] %s16_s13  ;;  %s29_s16 = int_to_ptr.hbm [resolvable:$true] %s28_s16 }
   0x4   :  { %s2713_s17 = smov 128   ;;  %s2714_s18 = smov 8  }
   0x5   :  { %22 = dma.hbm_to_vmem [thread:$0]  %s15_s11, 256, %s17_s13, [#allocation4], %s2713_s17, %s2713_s17, %s2714_s18  }
   0x6   :  { %s2715_s19 = smov [#allocation6]  }
   0x7   :  { %s30_s20 = sshll.u32 %s2715_s19, 4  ;;  %s31_s20 = int_to_ptr.vmem [resolvable:$true] %s30_s20 }
   0x8   :  { %33 = dma.hbm_to_vmem [thread:$0]  %s29_s16, 384, %s31_s20, [#allocation7]  }
   0x9   :  { %2706 = dma.done.wait [#allocation4], 256  }
   0xa   :  { %2707 = vsyncadd [#allocation4], 4294967040  ;;  %v46_v0 = vlaneseq }
   0xb   :  { %2708 = dma.done.wait [#allocation7], 384  }
   0xc   :  { %2709 = vsyncadd [#allocation7], 4294966912  ;;  %v2716_v1 = vmov 0.0   ;;  %v47_v2 = vand.u32 127, %v46_v0  ;;  %s2717_s0 = smov 111   ;;  %s2718_s1 = smov 113  }
   0xd   :  { %303 = vst [vmem:[#allocation2 + $0x30] sm:$0xff] %v2716_v1  ;;  %s2719_s21 = smov 127   ;;  %s2720_s22 = smov 1  }
   0xe   :  { %v53_v3 = vadd.s32 768, %v47_v2  ;;  %v54_v4 = vadd.s32 896, %v47_v2  ;;  %v49_v5 = vadd.s32 256, %v47_v2  ;;  %v50_v6 = vadd.s32 384, %v47_v2  ;;  %305 = vst [vmem:[#allocation2 + $0x18] sm:$0xff] %v2716_v1  ;;  %s2721_s23 = smov 15  }
   0xf   :  { %v48_v7 = vadd.s32 128, %v47_v2  ;;  %v59_v8 = vand.u32 511, %v47_v2  ;;  %v51_v9 = vadd.s32 512, %v47_v2  ;;  %v52_v10 = vadd.s32 640, %v47_v2  ;;  %306 = vst [vmem:[#allocation2 + $0x10] sm:$0xff] %v2716_v1  ;;  %s2722_s24 = smov 17  }
  0x10   :  { %v101_v11 = vand.u32 511, %v53_v3  ;;  %v108_v12 = vand.u32 511, %v54_v4  ;;  %v73_v13 = vand.u32 511, %v49_v5  ;;  %v80_v14 = vand.u32 511, %v50_v6  ;;  %309 = vst [vmem:[#allocation2 + $0x8] sm:$0xff] %v2716_v1  ;;  %s2723_s25 = smov 95  }
  0x11   :  { %v66_v15 = vand.u32 511, %v48_v7  ;;  %v1843_v16 = vadd.s32 4294967168, %v59_v8  ;;  %v87_v17 = vand.u32 511, %v51_v9  ;;  %v94_v18 = vand.u32 511, %v52_v10  ;;  %310 = vst [vmem:[#allocation2 + $0x20] sm:$0xff] %v2716_v1  ;;  %s2724_s26 = smov 126  }
  0x12   :  { %v1849_v19 = vadd.s32 4294967168, %v101_v11  ;;  %v1850_v20 = vadd.s32 4294967168, %v108_v12  ;;  %v1845_v21 = vadd.s32 4294967168, %v73_v13  ;;  %v1846_v22 = vadd.s32 4294967168, %v80_v14  ;;  %s2725_s27 = smov 112   ;;  %s2726_s28 = smov 110  }
  0x13   :  { %v1844_v23 = vadd.s32 4294967168, %v66_v15  ;;  %v160_v24 = vsub.s32 0, %v1843_v16  ;;  %v1847_v25 = vadd.s32 4294967168, %v87_v17  ;;  %v1848_v26 = vadd.s32 4294967168, %v94_v18  ;;  %v2808_v15 = vld [vmem:[#allocation3] sm:$0xff]  ;;  %v2811_v16 = vld [vmem:[#allocation3 + $0x8] sm:$0xff] }
  0x14   :  { %v205_v27 = vand.u32 15, %v1849_v19  ;;  %v212_v28 = vand.u32 15, %v1850_v20  ;;  %v177_v29 = vand.u32 15, %v1845_v21  ;;  %v184_v30 = vand.u32 15, %v1846_v22  ;;  %4036 = vst [vmem:[#allocation12_spill] sm:$0xff] %v2808_v15  ;;  %s2727_s29 = smov 96  }
  0x15   :  { %v163_v31 = vand.u32 15, %v160_v24  ;;  %v170_v32 = vand.u32 15, %v1844_v23  ;;  %v188_v33 = vsub.s32 0, %v1847_v25  ;;  %v198_v34 = vand.u32 15, %v1848_v26  ;;  %316 = vst [vmem:[#allocation1] ss:$2 sm:$0xff] %v2808_v15 }
  0x16   :  { %vm221_vm0 = vcmp.ne.s32.totalorder %v205_v27, 0  ;;  %vm222_vm1 = vcmp.ne.s32.totalorder %v212_v28, 0  ;;  %vm229_vm2 = vcmp.lt.s32.totalorder %v205_v27, 0  ;;  %vm230_vm3 = vcmp.lt.s32.totalorder %v212_v28, 0  ;;  %4037 = vst [vmem:[#allocation13_spill] sm:$0xff] %v2811_v16  ;;  %s2729_s30 = smov 94  }
  0x17   :  { %vm237_vm4 = vmand %vm229_vm2, %vm221_vm0  ;;  %v245_v35 = vadd.s32 16, %v205_v27  ;;  %v246_v36 = vadd.s32 16, %v212_v28  ;;  %vm217_vm5 = vcmp.ne.s32.totalorder %v177_v29, 0  ;;  %vm218_vm6 = vcmp.ne.s32.totalorder %v184_v30, 0  ;;  %s2733_s3 = smov [#allocation8]   ;;  %s1829_s7 = sshll.u32 %s3994_s2, 4  ;;  %s1830_s7 = int_to_ptr.hbm [resolvable:$true] %s1829_s7 }
  0x18   :  { %vm238_vm7 = vmand %vm230_vm3, %vm222_vm1  ;;  %vm225_vm8 = vcmp.lt.s32.totalorder %v177_v29, 0  ;;  %vm226_vm9 = vcmp.lt.s32.totalorder %v184_v30, 0  ;;  %v241_v37 = vadd.s32 16, %v177_v29  ;;  %v242_v38 = vadd.s32 16, %v184_v30  ;;  %s1827_s4 = sshll.u32 %s2733_s3, 4  ;;  %s1828_s4 = int_to_ptr.vmem [resolvable:$true] %s1827_s4 }
  0x19   :  { %v253_v39 = vsel %vm237_vm4, %v245_v35, %v205_v27  ;;  %v254_v40 = vsel %vm238_vm7, %v246_v36, %v212_v28  ;;  %vm233_vm10 = vmand %vm225_vm8, %vm217_vm5  ;;  %v164_v41 = vsub.s32 0, %v163_v31  ;;  %vm216_vm11 = vcmp.ne.s32.totalorder %v170_v32, 0 }
  0x1a   :  { %vm261_vm12 = vcmp.ge.s32.totalorder %v253_v39, 1  ;;  %vm262_vm13 = vcmp.ge.s32.totalorder %v254_v40, 1  ;;  %vm285_vm14 = vcmp.le.s32.totalorder %v253_v39, 14  ;;  %vm286_vm15 = vcmp.le.s32.totalorder %v254_v40, 14  ;;  %vm234_vm0 = vmand %vm226_vm9, %vm218_vm6 }
  0x1b   :  { %v1857_v42 = vsel %vm261_vm12, 1.0, %v2716_v1  ;;  %v1858_v43 = vsel %vm262_vm13, 1.0, %v2716_v1  ;;  %v249_v44 = vsel %vm233_vm10, %v241_v37, %v177_v29  ;;  %v250_v45 = vsel %vm234_vm0, %v242_v38, %v184_v30 }
  0x1c   :  { %v2766_v46 = vpack.i.bf16 %v1858_v43, %v1857_v42  ;;  %vm257_vm1 = vcmp.ge.s32.totalorder %v249_v44, 1  ;;  %vm258_vm2 = vcmp.ge.s32.totalorder %v250_v45, 1  ;;  %v1865_v47 = vsel %vm285_vm14, 1.0, %v2716_v1  ;;  %v317_v17 = vld.sshfl [vmem:[#allocation1] sm:$0xff pattern:$0x75316420] }
  0x1d   :  { %v1853_v48 = vsel %vm257_vm1, 1.0, %v2716_v1  ;;  %v1854_v49 = vsel %vm258_vm2, 1.0, %v2716_v1  ;;  %v1866_v50 = vsel %vm286_vm15, 1.0, %v2716_v1  ;;  %vm215_vm3 = vcmp.ne.s32.totalorder %v164_v41, 0  ;;  %321 = vst [vmem:[#allocation2 + $0x18] sm:$0xf] %v317_v17 }
  0x1e   :  { %1907 = vrot.lane.b32.xlu1 %v2766_v46, %s2717_s0  ;;  %v2774_v51 = vpack.i.bf16 %v1854_v49, %v1853_v48  ;;  %v2776_v52 = vpack.i.bf16 %v1866_v50, %v1865_v47  ;;  %vm223_vm4 = vcmp.lt.s32.totalorder %v164_v41, 0  ;;  %vm224_vm5 = vcmp.lt.s32.totalorder %v170_v32, 0  ;;  %v318_v18 = vld.sshfl [vmem:[#allocation1 + $0x8] sm:$0xff pattern:$0x75316420] }
  0x1f   :  { %vm231_vm6 = vmand %vm223_vm4, %vm215_vm3  ;;  %v239_v53 = vadd.s32 16, %v164_v41  ;;  %v240_v54 = vadd.s32 16, %v170_v32  ;;  %v191_v55 = vand.u32 15, %v188_v33  ;;  %vm220_vm7 = vcmp.ne.s32.totalorder %v198_v34, 0  ;;  %324 = vst [vmem:[#allocation1] ss:$2 sm:$0xff] %v2811_v16 }
  0x20   :  { %1902 = vrot.lane.b32.xlu0 %v2774_v51, %s2717_s0  ;;  %vm232_vm8 = vmand %vm224_vm5, %vm216_vm11  ;;  %vm228_vm9 = vcmp.lt.s32.totalorder %v198_v34, 0  ;;  %v244_v56 = vadd.s32 16, %v198_v34  ;;  %vm281_vm10 = vcmp.le.s32.totalorder %v249_v44, 14  ;;  %vm282_vm12 = vcmp.le.s32.totalorder %v250_v45, 14  ;;  %322 = vst [vmem:[#allocation2 + $0x10] sm:$0xf] %v318_v18 }
  0x21   :  { %v247_v57 = vsel %vm231_vm6, %v239_v53, %v164_v41  ;;  %v248_v58 = vsel %vm232_vm8, %v240_v54, %v170_v32  ;;  %v192_v59 = vsub.s32 0, %v191_v55  ;;  %vm236_vm13 = vmand %vm228_vm9, %vm220_vm7  ;;  %v1861_v60 = vsel %vm281_vm10, 1.0, %v2716_v1 }
  0x22   :  { %vm255_vm14 = vcmp.ge.s32.totalorder %v247_v57, 1  ;;  %vm256_vm15 = vcmp.ge.s32.totalorder %v248_v58, 1  ;;  %v252_v61 = vsel %vm236_vm13, %v244_v56, %v198_v34  ;;  %v1862_v62 = vsel %vm282_vm12, 1.0, %v2716_v1 }
  0x23   :  { %v1851_v63 = vsel %vm255_vm14, 1.0, %v2716_v1  ;;  %v1852_v0 = vsel %vm256_vm15, 1.0, %v2716_v1  ;;  %vm219_vm11 = vcmp.ne.s32.totalorder %v192_v59, 0  ;;  %vm227_vm0 = vcmp.lt.s32.totalorder %v192_v59, 0 }
  0x24   :  { %v1921_v2 = vpack.i.bf16 %v1852_v0, %v1851_v63  ;;  %vm235_vm1 = vmand %vm227_vm0, %vm219_vm11  ;;  %v243_v3 = vadd.s32 16, %v192_v59  ;;  %vm260_vm2 = vcmp.ge.s32.totalorder %v252_v61, 1  ;;  %v1911_v4 = vpack.i.bf16 %v1862_v62, %v1861_v60  ;;  %v2814_v19 = vld [vmem:[#allocation2 + $0x18] sm:$0xff] }
  0x25   :  { %vm279_vm3 = vcmp.le.s32.totalorder %v247_v57, 14  ;;  %vm284_vm4 = vcmp.le.s32.totalorder %v252_v61, 14  ;;  %vm280_vm5 = vcmp.le.s32.totalorder %v248_v58, 14  ;;  %v1856_v6 = vsel %vm260_vm2, 1.0, %v2716_v1 }
  0x26   :  { %1917 = vrot.lane.b32.xlu1 %v2776_v52, %s2718_s1  ;;  %v251_v5 = vsel %vm235_vm1, %v243_v3, %v192_v59  ;;  %1912 = vrot.lane.b32.xlu2 %v1911_v4, %s2718_s1  ;;  %v1859_v8 = vsel %vm279_vm3, 1.0, %v2716_v1  ;;  %v1860_v9 = vsel %vm280_vm5, 1.0, %v2716_v1  ;;  %v1864_v11 = vsel %vm284_vm4, 1.0, %v2716_v1  ;;  %v325_v21 = vld.sshfl [vmem:[#allocation1] sm:$0xff pattern:$0x75316420] }
  0x27   :  { %vm259_vm6 = vcmp.ge.s32.totalorder %v251_v5, 1  ;;  %vm283_vm7 = vcmp.le.s32.totalorder %v251_v5, 14  ;;  %v1926_v13 = vpack.i.bf16 %v1860_v9, %v1859_v8  ;;  %v2021_v20 = vpack.i.bf16 %v2814_v19, %v2716_v1  ;;  %v326_v22 = vld.sshfl [vmem:[#allocation1 + $0x8] sm:$0xff pattern:$0x75316420]  ;;  %v2819_v23 = vld [vmem:[#allocation2 + $0x10] sm:$0xff] }
  0x28   :  { %1922 = vrot.lane.b32.xlu0 %v1921_v2, %s2717_s0  ;;  %v1855_v7 = vsel %vm259_vm6, 1.0, %v2716_v1  ;;  %v1863_v10 = vsel %vm283_vm7, 1.0, %v2716_v1  ;;  %329 = vst [vmem:[#allocation2 + $0x8] sm:$0xf] %v325_v21  ;;  %v2026_v25 = vpack.i.bf16 0.0, %v2819_v23  ;;  %vm406_vm8 = vcmask 924672  }
  0x29   :  { %v1936_v12 = vpack.i.bf16 %v1856_v6, %v1855_v7  ;;  %v1941_v14 = vpack.i.bf16 %v1864_v11, %v1863_v10  ;;  %330 = vst [vmem:[#allocation2 + $0x20] sm:$0xf] %v326_v22  ;;  %vm446_vm9 = vcmask 1039360   ;;  %vm361_vm10 = vcmask 908288  }
  0x2a   :  { %vm494_vm12 = vcmask 7168   ;;  %vm534_vm13 = vcmask 121856   ;;  %vm574_vm14 = vcmask 138240   ;;  %vm798_vm15 = vcmask 777216  }
  0x2b   :  { %vm652_vm11 = vcmask 1031168   ;;  %vm683_vm0 = vcmask 916480   ;;  %vm829_vm1 = vcmask 769024   ;;  %vm736_vm2 = vcmask 900096  }
  0x2c   :  { %vm767_vm3 = vcmask 785408   ;;  %vm1027_vm4 = vcmask 588800   ;;  %vm1810_vm7 = vcmask 1043456  }
  0x2e   :  { %1937 = vrot.lane.b32.xlu1 %v1936_v12, %s2717_s0  ;;  %1927 = vrot.lane.b32.xlu2 %v1926_v13, %s2718_s1 }
  0x2f   :  { %v2821_v24 = vld [vmem:[#allocation2 + $0x8] sm:$0xff] }
  0x30   :  { %1942 = vrot.lane.b32.xlu0 %v1941_v14, %s2718_s1  ;;  %v2031_v26 = vpack.i.bf16 %v2821_v24, %v2716_v1  ;;  %v2826_v27 = vld [vmem:[#allocation2 + $0x20] sm:$0xff] }
  0x31   :  { %v2036_v28 = vpack.i.bf16 0.0, %v2826_v27 }
  0x36   :  { %1952 = vrot.lane.b32.xlu1 %v1936_v12, %s2719_s21  ;;  %1932 = vrot.lane.b32.xlu2 %v1921_v2, %s2719_s21 }
  0x38   :  { %1947 = vrot.lane.b32.xlu0 %v2774_v51, %s2719_s21 }
  0x3e   :  { %1967 = vrot.lane.b32.xlu1 %v1911_v4, %s2720_s22  ;;  %1957 = vrot.lane.b32.xlu2 %v2766_v46, %s2719_s21 }
  0x40   :  { %1962 = vrot.lane.b32.xlu0 %v1926_v13, %s2720_s22 }
  0x46   :  { %1982 = vrot.lane.b32.xlu1 %v1921_v2, %s2721_s23  ;;  %1972 = vrot.lane.b32.xlu2 %v1941_v14, %s2720_s22 }
  0x48   :  { %1977 = vrot.lane.b32.xlu0 %v2776_v52, %s2720_s22 }
  0x4e   :  { %1997 = vrot.lane.b32.xlu1 %v2766_v46, %s2721_s23  ;;  %1987 = vrot.lane.b32.xlu2 %v2774_v51, %s2721_s23 }
  0x50   :  { %1992 = vrot.lane.b32.xlu0 %v1936_v12, %s2721_s23 }
  0x56   :  { %2012 = vrot.lane.b32.xlu1 %v1941_v14, %s2722_s24  ;;  %2002 = vrot.lane.b32.xlu2 %v1926_v13, %s2722_s24 }
  0x58   :  { %2007 = vrot.lane.b32.xlu0 %v1911_v4, %s2722_s24 }
  0x5e   :  { %2017 = vrot.lane.b32.xlu2 %v2776_v52, %s2722_s24  ;;  %2027 = vrot.lane.b32.xlu1 %v2026_v25, %s2719_s21 }
  0x60   :  { %2022 = vrot.lane.b32.xlu0 %v2021_v20, %s2719_s21 }
  0x66   :  { %2032 = vrot.lane.b32.xlu2 %v2031_v26, %s2719_s21  ;;  %2047 = vrot.lane.b32.xlu1 %v2026_v25, %s2717_s0 }
  0x68   :  { %2037 = vrot.lane.b32.xlu0 %v2036_v28, %s2719_s21 }
  0x6e   :  { %2052 = vrot.lane.b32.xlu2 %v2031_v26, %s2717_s0  ;;  %2067 = vrot.lane.b32.xlu1 %v2026_v25, %s2723_s25 }
  0x70   :  { %2042 = vrot.lane.b32.xlu0 %v2021_v20, %s2717_s0 }
  0x76   :  { %2072 = vrot.lane.b32.xlu2 %v2031_v26, %s2723_s25 }
  0x78   :  { %2057 = vrot.lane.b32.xlu0 %v2036_v28, %s2717_s0 }
  0x80   :  { %v2832_v29 = vpop.permute.xlu2 %1912  ;;  %2062 = vrot.lane.b32.xlu0 %v2021_v20, %s2723_s25 }
  0x81   :  { %v1915_v30 = vunpack.i.h.bf16 %v2832_v29  ;;  %v1914_v31 = vunpack.i.l.bf16 %v2832_v29 }
  0x83   :  { %v2841_v1 = vsel %vm406_vm8, %v1914_v31, %v1915_v30 }
  0x88   :  { %v2844_v32 = vpop.permute.xlu2 %1927  ;;  %2077 = vrot.lane.b32.xlu0 %v2036_v28, %s2723_s25 }
  0x89   :  { %v1930_v20 = vunpack.i.h.bf16 %v2844_v32  ;;  %v1929_v21 = vunpack.i.l.bf16 %v2844_v32 }
  0x90   :  { %v2849_v33 = vpop.permute.xlu1 %1907  ;;  %v2851_v34 = vpop.permute.xlu2 %1932 }
  0x91   :  { %v3997_v53 = vunpack.i.l.bf16 %v2849_v33 }
  0x92   :  { %v2853_v35 = vpop.permute.xlu0 %1902 }
  0x93   :  { %v3995_v43 = vunpack.i.l.bf16 %v2853_v35 }
  0x98   :  { %v2856_v36 = vpop.permute.xlu1 %1917  ;;  %v2862_v39 = vpop.permute.xlu2 %1957 }
  0x99   :  { %v2859_v37 = vunpack.i.h.bf16 %v2856_v36  ;;  %v1919_v38 = vunpack.i.l.bf16 %v2856_v36  ;;  %v2867_v41 = vunpack.i.h.bf16 %v2862_v39  ;;  %v3999_v42 = vunpack.i.l.bf16 %v2862_v39 }
  0x9a   :  { %v2864_v40 = vpop.permute.xlu0 %1922 }
  0x9b   :  { %4038 = vst [vmem:[#allocation14_spill] sm:$0xff] %v2859_v37  ;;  %v2875_v44 = vsel %vm406_vm8, %v1919_v38, %v2859_v37  ;;  %v3998_v45 = vunpack.i.h.bf16 %v2864_v40  ;;  %v429_v46 = vmul.f32 0.0, %v2859_v37  ;;  %v2883_v47 = vsel %vm446_vm9, %v3999_v42, %v2867_v41 }
  0x9c   :  { %4039 = vst [vmem:[#allocation15_spill] sm:$0xff] %v2875_v44  ;;  %v469_v48 = vmul.f32 0.0, %v2867_v41  ;;  %v428_v49 = vmul.f32 %v2875_v44, %v2826_v27  ;;  %v468_v51 = vmul.f32 %v2883_v47, %v2826_v27 }
  0x9d   :  { %v2894_v50 = vsel %vm361_vm10, %v3998_v45, %v3995_v43 }
  0x9e   :  { %v2081_v52 = vpack.i.bf16 %v429_v46, %v428_v49  ;;  %v2086_v54 = vpack.i.bf16 %v469_v48, %v468_v51 }
  0xa0   :  { %v2899_v55 = vpop.permute.xlu1 %1937  ;;  %2082 = vrot.lane.b32.xlu1 %v2081_v52, %s2724_s26  ;;  %2087 = vrot.lane.b32.xlu2 %v2086_v54, %s2725_s27  ;;  %v2914_v61 = vpop.permute.xlu2 %1972 }
  0xa1   :  { %v3996_v56 = vunpack.i.h.bf16 %v2899_v55  ;;  %v1974_v12 = vunpack.i.l.bf16 %v2914_v61  ;;  %v1975_v22 = vunpack.i.h.bf16 %v2914_v61 }
  0xa2   :  { %v1943_v57 = vpop.permute.xlu0 %1942 }
  0xa3   :  { %v2909_v58 = vsel %vm361_vm10, %v3996_v56, %v3997_v53  ;;  %v1944_v59 = vunpack.i.l.bf16 %v1943_v57  ;;  %v1945_v49 = vunpack.i.h.bf16 %v1943_v57 }
  0xa4   :  { %4040 = vst [vmem:[#allocation16_spill] sm:$0xff] %v2909_v58 }
  0xa5   :  { %v2912_v60 = vsel %vm406_vm8, %v1915_v30, %v1944_v59 }
  0xa8   :  { %v2916_v62 = vpop.permute.xlu1 %1952  ;;  %v2920_v0 = vpop.permute.xlu2 %1987 }
  0xa9   :  { %v1990_v6 = vunpack.i.h.bf16 %v2920_v0  ;;  %v1989_v10 = vunpack.i.l.bf16 %v2920_v0 }
  0xaa   :  { %v2918_v63 = vpop.permute.xlu0 %1947 }
  0xab   :  { %v537_v17 = vsel %vm534_vm13, %v1989_v10, %v1990_v6 }
  0xac   :  { %v2960_v32 = vmul.f32 0.0, %v537_v17 }
  0xb0   :  { %v1968_v2 = vpop.permute.xlu1 %1967 }
  0xb1   :  { %v1970_v3 = vunpack.i.h.bf16 %v1968_v2  ;;  %v1969_v4 = vunpack.i.l.bf16 %v1968_v2 }
  0xb2   :  { %v2922_v5 = vpop.permute.xlu0 %1962 }
  0xb3   :  { %v497_v7 = vsel %vm494_vm12, %v1969_v4, %v1970_v3  ;;  %v1965_v8 = vunpack.i.h.bf16 %v2922_v5  ;;  %v1964_v9 = vunpack.i.l.bf16 %v2922_v5  ;;  %v498_v28 = vsel %vm494_vm12, %v1970_v3, %v1974_v12 }
  0xb4   :  { %v2929_v11 = vmul.f32 0.0, %v497_v7  ;;  %v2978_v7 = vsel %vm406_vm8, %v1930_v20, %v1914_v31  ;;  %v2999_v31 = vsel %vm406_vm8, %v1945_v49, %v1919_v38 }
  0xb5   :  { %v2935_v13 = vsel %vm494_vm12, %v1965_v8, %v1969_v4  ;;  %v2944_v18 = vmul.f32 0.0, %v1964_v9  ;;  %v2969_v4 = vmul.f32 0.0, %v498_v28  ;;  %4043 = vst [vmem:[#allocation19_spill] sm:$0xff] %v2978_v7 }
  0xb6   :  { %4041 = vst [vmem:[#allocation17_spill] sm:$0xff] %v2935_v13  ;;  %v512_v14 = vmul.f32 %v2935_v13, %v2819_v23 }
  0xb7   :  { %4045 = vst [vmem:[#allocation21_spill] sm:$0xff] %v2999_v31 }
  0xb8   :  { %v2949_v25 = vpop.permute.xlu1 %1982  ;;  %v2091_v26 = vpack.i.bf16 %v2929_v11, %v512_v14  ;;  %v2981_v14 = vsel %vm406_vm8, %v1929_v21, %v1930_v20  ;;  %v3002_v20 = vsel %vm406_vm8, %v1944_v59, %v1945_v49  ;;  %v423_v59 = vmul.f32 %v2978_v7, %v2814_v19 }
  0xb9   :  { %v4004_v30 = vunpack.i.h.bf16 %v2949_v25  ;;  %v4001_v46 = vunpack.i.l.bf16 %v2949_v25  ;;  %4044 = vst [vmem:[#allocation20_spill] sm:$0xff] %v2981_v14  ;;  %v422_v38 = vmul.f32 0.0, %v2981_v14  ;;  %v4003_v49 = vunpack.i.l.bf16 %v2916_v62 }
  0xba   :  { %v1978_v51 = vpop.permute.xlu0 %1977  ;;  %2092 = vrot.lane.b32.xlu2 %v2091_v26, %s2726_s28  ;;  %v2989_v26 = vpop.permute.xlu2 %2002  ;;  %4046 = vst [vmem:[#allocation22_spill] sm:$0xff] %v3002_v20  ;;  %v1950_v21 = vunpack.i.h.bf16 %v2918_v63 }
  0xbb   :  { %v2965_v52 = vsel %vm534_vm13, %v4004_v30, %v1989_v10  ;;  %v1980_v54 = vunpack.i.h.bf16 %v1978_v51  ;;  %v1979_v2 = vunpack.i.l.bf16 %v1978_v51  ;;  %v2973_v57 = vmul.f32 0.0, %v4001_v46 }
  0xbc   :  { %4042 = vst [vmem:[#allocation18_spill] sm:$0xff] %v2965_v52  ;;  %v552_v3 = vmul.f32 %v2965_v52, %v2819_v23  ;;  %v3086_v30 = vsel %vm494_vm12, %v1974_v12, %v1975_v22 }
  0xbd   :  { %v2986_v10 = vsel %vm494_vm12, %v1975_v22, %v1979_v2  ;;  %v501_v17 = vsel %vm494_vm12, %v1979_v2, %v1980_v54 }
  0xbe   :  { %v516_v28 = vmul.f32 %v2986_v10, %v2826_v27  ;;  %v2993_v51 = vmul.f32 0.0, %v501_v17  ;;  %v2101_v29 = vpack.i.bf16 %v2960_v32, %v552_v3 }
  0xc0   :  { %v1998_v54 = vpop.permute.xlu1 %1997  ;;  %v2096_v2 = vpack.i.bf16 %v2993_v51, %v516_v28  ;;  %2102 = vrot.lane.b32.xlu0 %v2101_v29, %s2727_s29  ;;  %v426_v28 = vmul.f32 0.0, %v3002_v20  ;;  %v427_v29 = vmul.f32 %v2999_v31, %v2821_v24 }
  0xc1   :  { %v2000_v17 = vunpack.i.h.bf16 %v1998_v54  ;;  %v1999_v36 = vunpack.i.l.bf16 %v1998_v54  ;;  %v1949_v54 = vunpack.i.l.bf16 %v2918_v63 }
  0xc2   :  { %v3015_v48 = vpop.permute.xlu0 %1992  ;;  %2097 = vrot.lane.b32.xlu1 %v2096_v2, %s2726_s28  ;;  %v3037_v63 = vpop.permute.xlu2 %2017  ;;  %v2146_v42 = vpack.i.bf16 %v427_v29, %v426_v28 }
  0xc3   :  { %v541_v3 = vsel %vm534_vm13, %v1999_v36, %v2000_v17  ;;  %v4000_v43 = vunpack.i.h.bf16 %v3015_v48  ;;  %v4002_v56 = vunpack.i.l.bf16 %v3015_v48  ;;  %v2020_v28 = vunpack.i.h.bf16 %v3037_v63 }
  0xc4   :  { %v3025_v53 = vmul.f32 0.0, %v541_v3  ;;  %v3044_v3 = vsel %vm446_vm9, %v1950_v21, %v4003_v49  ;;  %v4007_v29 = vunpack.i.l.bf16 %v3037_v63 }
  0xc5   :  { %v3030_v45 = vsel %vm534_vm13, %v4000_v43, %v1999_v36  ;;  %v538_v2 = vsel %vm534_vm13, %v1990_v6, %v4002_v56  ;;  %4047 = vst [vmem:[#allocation23_spill] sm:$0xff] %v3044_v3  ;;  %v3047_v36 = vsel %vm446_vm9, %v1949_v54, %v1950_v21  ;;  %v2116_v43 = vpack.i.bf16 %v423_v59, %v422_v38 }
  0xc6   :  { %v556_v17 = vmul.f32 %v3030_v45, %v2826_v27  ;;  %4048 = vst [vmem:[#allocation24_spill] sm:$0xff] %v3047_v36  ;;  %v3049_v46 = vmul.f32 0.0, %v538_v2  ;;  %v3062_v21 = vsel %vm494_vm12, %v1964_v9, %v1965_v8  ;;  %v2005_v38 = vunpack.i.h.bf16 %v2989_v26 }
  0xc7   :  { %4049 = vst [vmem:[#allocation25_spill] sm:$0xff] %v3062_v21  ;;  %v2004_v59 = vunpack.i.l.bf16 %v2989_v26  ;;  %v465_v5 = vmul.f32 0.0, %v3044_v3  ;;  %v1935_v9 = vunpack.i.h.bf16 %v2851_v34  ;;  %v2728_v26 = vmov 0  }
  0xc8   :  { %v2106_v0 = vpack.i.bf16 %v3025_v53, %v556_v17  ;;  %2147 = vrot.lane.b32.xlu0 %v2146_v42, %s2724_s26  ;;  %v3053_v6 = vpop.permute.xlu1 %2012  ;;  %v464_v17 = vmul.f32 %v3047_v36, %v2819_v23  ;;  %2181 = vset.pattern.permute.xlu2 %v2728_v26  ;;  %v1934_v42 = vunpack.i.l.bf16 %v2851_v34 }
  0xc9   :  { %v2014_v8 = vunpack.i.l.bf16 %v3053_v6  ;;  %v3092_v34 = vmul.f32 0.0, %v2004_v59  ;;  %v3100_v61 = vsel %vm574_vm14, %v2004_v59, %v2005_v38 }
  0xca   :  { %v2008_v2 = vpop.permute.xlu0 %2007  ;;  %2107 = vrot.lane.b32.xlu2 %v2106_v0, %s2727_s29  ;;  %2117 = vrot.lane.b32.xlu1 %v2116_v43, %s2724_s26  ;;  %v511_v0 = vmul.f32 %v3062_v21, %v2814_v19  ;;  %v581_v43 = vsel %vm574_vm14, %v4007_v29, %v2020_v28  ;;  %v2151_v28 = vpack.i.bf16 %v465_v5, %v464_v17 }
  0xcb   :  { %v2010_v56 = vunpack.i.h.bf16 %v2008_v2  ;;  %v2009_v49 = vunpack.i.l.bf16 %v2008_v2  ;;  %4051 = vst [vmem:[#allocation27_spill] sm:$0xff] %v3100_v61  ;;  %v3104_v22 = vmul.f32 0.0, %v581_v43  ;;  %v3107_v20 = vsel %vm446_vm9, %v1934_v42, %v1935_v9 }
  0xcc   :  { %4052 = vst [vmem:[#allocation28_spill] sm:$0xff] %v3107_v20  ;;  %v515_v17 = vmul.f32 %v3086_v30, %v2821_v24  ;;  %v462_v42 = vmul.f32 0.0, %v3107_v20  ;;  %v4055_v43 = vunpack.i.h.bf16 %v2949_v25 }
  0xcd   :  { %v3089_v2 = vsel %vm574_vm14, %v2005_v38, %v2009_v49  ;;  %v577_v26 = vsel %vm574_vm14, %v2009_v49, %v2010_v56  ;;  %v578_v29 = vsel %vm574_vm14, %v2010_v56, %v2014_v8  ;;  %v3115_v56 = vsel %vm446_vm9, %v1935_v9, %v1949_v54 }
  0xce   :  { %4050 = vst [vmem:[#allocation26_spill] sm:$0xff] %v3089_v2  ;;  %v592_v16 = vmul.f32 %v3089_v2, %v2819_v23  ;;  %v3096_v15 = vmul.f32 0.0, %v577_v26  ;;  %v3102_v12 = vmul.f32 0.0, %v578_v29  ;;  %v2126_v26 = vpack.i.bf16 %v511_v0, %v2944_v18 }
  0xcf   :  { %4053 = vst [vmem:[#allocation29_spill] sm:$0xff] %v3115_v56  ;;  %v2015_v29 = vunpack.i.h.bf16 %v3053_v6  ;;  %v463_v54 = vmul.f32 %v3115_v56, %v2814_v19  ;;  %v1955_v6 = vunpack.i.h.bf16 %v2916_v62  ;;  %v2161_v9 = vpack.i.bf16 %v515_v17, %v2969_v4 }
  0xd0   :  { %v2111_v49 = vpack.i.bf16 %v3096_v15, %v592_v16  ;;  %2152 = vrot.lane.b32.xlu0 %v2151_v28, %s2725_s27  ;;  %v591_v16 = vmul.f32 %v3100_v61, %v2814_v19  ;;  %v4056_v28 = vunpack.i.l.bf16 %v2949_v25  ;;  %v4060_v17 = vunpack.i.l.bf16 %v2862_v39 }
  0xd1   :  { %v3131_v5 = vsel %vm574_vm14, %v2014_v8, %v2015_v29  ;;  %v4058_v8 = vunpack.i.l.bf16 %v2916_v62 }
  0xd2   :  { %2112 = vrot.lane.b32.xlu2 %v2111_v49, %s2729_s30  ;;  %2127 = vrot.lane.b32.xlu1 %v2126_v26, %s2726_s28  ;;  %4054 = vst [vmem:[#allocation30_spill] sm:$0xff] %v3131_v5  ;;  %v2136_v0 = vpack.i.bf16 %v591_v16, %v3092_v34  ;;  %v3140_v49 = vsel %vm534_vm13, %v4056_v28, %v4055_v43  ;;  %v4064_v28 = vunpack.i.h.bf16 %v3015_v48 }
  0xd3   :  { %4057 = vst [vmem:[#allocation31_spill] sm:$0xff] %v3140_v49  ;;  %v2121_v26 = vpack.i.bf16 %v463_v54, %v462_v42  ;;  %v595_v59 = vmul.f32 %v3131_v5, %v2821_v24  ;;  %v3148_v38 = vsel %vm446_vm9, %v4058_v8, %v1955_v6  ;;  %v3153_v16 = vsel %vm446_vm9, %v1955_v6, %v4060_v17 }
  0xd4   :  { %4059 = vst [vmem:[#allocation32_spill] sm:$0xff] %v3148_v38  ;;  %v551_v25 = vmul.f32 %v3140_v49, %v2814_v19  ;;  %v1924_v42 = vunpack.i.l.bf16 %v2864_v40  ;;  %v466_v62 = vmul.f32 0.0, %v3148_v38  ;;  %v4062_v6 = vunpack.i.h.bf16 %v2864_v40 }
  0xd5   :  { %4061 = vst [vmem:[#allocation33_spill] sm:$0xff] %v3153_v16  ;;  %v2171_v54 = vpack.i.bf16 %v595_v59, %v3102_v12  ;;  %v375_v40 = vmul.f32 %v2894_v50, %v2814_v19  ;;  %v425_v17 = vmul.f32 0.0, %v2912_v60 }
  0xd6   :  { %v2131_v39 = vpack.i.bf16 %v551_v25, %v2973_v57  ;;  %v3168_v43 = vsel %vm361_vm10, %v1924_v42, %v4062_v6  ;;  %v2023_v42 = vpop.permute.xlu0 %2022 }
  0xd7   :  { %4063 = vst [vmem:[#allocation34_spill] sm:$0xff] %v3168_v43  ;;  %v374_v8 = vmul.f32 0.0, %v3168_v43 }
  0xd8   :  { %2162 = vrot.lane.b32.xlu0 %v2161_v9, %s2726_s28  ;;  %v467_v9 = vmul.f32 %v3153_v16, %v2821_v24 }
  0xda   :  { %2122 = vrot.lane.b32.xlu2 %v2121_v26, %s2725_s27  ;;  %2137 = vrot.lane.b32.xlu1 %v2136_v0, %s2729_s30  ;;  %v2156_v0 = vpack.i.bf16 %v467_v9, %v466_v62  ;;  %v4065_v26 = vunpack.i.l.bf16 %v3015_v48  ;;  %v424_v48 = vmul.f32 %v2841_v1, %v2819_v23  ;;  %v4066_v62 = vunpack.i.l.bf16 %v3037_v63 }
  0xdc   :  { %v3176_v59 = vsel %vm534_vm13, %v4065_v26, %v4064_v28  ;;  %v3191_v9 = vsel %vm574_vm14, %v2015_v29, %v4066_v62  ;;  %v1939_v28 = vunpack.i.l.bf16 %v2899_v55  ;;  %v1905_v26 = vunpack.i.h.bf16 %v2853_v35 }
  0xdd   :  { %v555_v25 = vmul.f32 %v3176_v59, %v2821_v24  ;;  %4067 = vst [vmem:[#allocation35_spill] sm:$0xff] %v3191_v9  ;;  %v596_v19 = vmul.f32 %v3191_v9, %v2826_v27  ;;  %v2025_v62 = vunpack.i.h.bf16 %v2023_v42 }
  0xde   :  { %v2038_v29 = vpop.permute.xlu0 %2037 }
  0xdf   :  { %v2166_v6 = vpack.i.bf16 %v555_v25, %v3049_v46  ;;  %v2176_v63 = vpack.i.bf16 %v3104_v22, %v596_v19 }
  0xe0   :  { %2172 = vrot.lane.b32.xlu0 %v2171_v54, %s2729_s30  ;;  %v2182_v54 = vpack.i.bf16 %v375_v40, %v374_v8  ;;  %v44_v8 = vld [vmem:[#allocation6 + $0x10] sm:$0xff]  ;;  %v2028_v40 = vpop.permute.xlu1 %2027 }
  0xe1   :  { %v2029_v43 = vunpack.i.l.bf16 %v2028_v40 }
  0xe2   :  { %2132 = vrot.lane.b32.xlu2 %v2131_v39, %s2727_s29  ;;  %2157 = vrot.lane.b32.xlu1 %v2156_v0, %s2725_s27  ;;  %v2141_v39 = vpack.i.bf16 %v425_v17, %v424_v48  ;;  %v1910_v0 = vunpack.i.h.bf16 %v2849_v33  ;;  %v4068_v17 = vunpack.i.l.bf16 %v2849_v33  ;;  %v4070_v48 = vunpack.i.h.bf16 %v2899_v55 }
  0xe4   :  { %v3206_v25 = vsel %vm361_vm10, %v4068_v17, %v1910_v0  ;;  %v378_v0 = vmul.f32 %v2909_v58, %v2821_v24 }
  0xe5   :  { %4069 = vst [vmem:[#allocation36_spill] sm:$0xff] %v3206_v25  ;;  %v379_v55 = vmul.f32 %v3206_v25, %v2826_v27  ;;  %v2039_v25 = vunpack.i.l.bf16 %v2038_v29 }
  0xe7   :  { %v2192_v24 = vpack.i.bf16 %v379_v55, %v378_v0 }
  0xe8   :  { %2183 = vrot.lane.b32.xlu0 %v2182_v54, %s2722_s24  ;;  %v3211_v54 = vsel %vm361_vm10, %v1939_v28, %v4070_v48 }
  0xe9   :  { %4071 = vst [vmem:[#allocation37_spill] sm:$0xff] %v3211_v54  ;;  %v377_v33 = vmul.f32 0.0, %v3211_v54  ;;  %v3228_v54 = vpop.permute.xlu1 %2047 }
  0xea   :  { %2142 = vrot.lane.b32.xlu2 %v2141_v39, %s2724_s26  ;;  %2167 = vrot.lane.b32.xlu1 %v2166_v6, %s2727_s29  ;;  %v2024_v39 = vunpack.i.l.bf16 %v2023_v42  ;;  %v4072_v6 = vunpack.i.l.bf16 %v2853_v35  ;;  %v623_v42 = vsel %vm446_vm9, %v2025_v62, %v2029_v43 }
  0xec   :  { %v3217_v19 = vsel %vm361_vm10, %v4072_v6, %v1905_v26  ;;  %v622_v28 = vsel %vm446_vm9, %v2024_v39, %v2025_v62  ;;  %v2030_v6 = vunpack.i.h.bf16 %v2028_v40 }
  0xed   :  { %v376_v35 = vmul.f32 %v3217_v19, %v2819_v23  ;;  %v2197_v26 = vpack.i.bf16 %v623_v42, %v622_v28  ;;  %v4013_v28 = vunpack.i.l.bf16 %v3228_v54 }
  0xee   :  { %v624_v27 = vsel %vm446_vm9, %v2029_v43, %v2030_v6 }
  0xef   :  { %v2187_v5 = vpack.i.bf16 %v377_v33, %v376_v35 }
  0xf0   :  { %2198 = vrot.lane.b32.xlu0 %v2197_v26, %s2722_s24 }
  0xf1   :  { %v2068_v33 = vpop.permute.xlu1 %2067 }
  0xf2   :  { %2177 = vrot.lane.b32.xlu1 %v2176_v63, %s2729_s30  ;;  %838 = vperm.xlu2 %2181, %v44_v8   ;;  %v2033_v63 = vpop.permute.xlu2 %2032  ;;  %v2043_v8 = vpop.permute.xlu0 %2042  ;;  %v2070_v55 = vunpack.i.h.bf16 %v2068_v33  ;;  %v2069_v35 = vunpack.i.l.bf16 %v2068_v33 }
  0xf3   :  { %v2035_v17 = vunpack.i.h.bf16 %v2033_v63  ;;  %v2034_v48 = vunpack.i.l.bf16 %v2033_v63  ;;  %v2045_v23 = vunpack.i.h.bf16 %v2043_v8  ;;  %v2044_v39 = vunpack.i.l.bf16 %v2043_v8 }
  0xf4   :  { %v2040_v63 = vunpack.i.h.bf16 %v2038_v29 }
  0xf5   :  { %v625_v62 = vsel %vm446_vm9, %v2034_v48, %v2035_v17  ;;  %v3237_v0 = vsel %vm361_vm10, %v2044_v39, %v2045_v23  ;;  %v626_v8 = vsel %vm446_vm9, %v2035_v17, %v2039_v25 }
  0xf6   :  { %v2202_v42 = vpack.i.bf16 %v625_v62, %v624_v27  ;;  %v627_v29 = vsel %vm446_vm9, %v2039_v25, %v2040_v63  ;;  %v3254_v27 = vsel %vm798_vm15, %v2069_v35, %v2070_v55 }
  0xf7   :  { %v2207_v6 = vpack.i.bf16 %v627_v29, %v626_v8 }
  0xfa   :  { %2188 = vrot.lane.b32.xlu1 %v2187_v5, %s2722_s24  ;;  %2193 = vrot.lane.b32.xlu2 %v2192_v24, %s2722_s24  ;;  %v2058_v40 = vpop.permute.xlu0 %2057  ;;  %v3242_v5 = vsel %vm361_vm10, %v2045_v23, %v4013_v28  ;;  %v2053_v26 = vpop.permute.xlu2 %2052 }
  0xfb   :  { %v2055_v62 = vunpack.i.h.bf16 %v2053_v26  ;;  %v2054_v23 = vunpack.i.l.bf16 %v2053_v26  ;;  %v2059_v39 = vunpack.i.l.bf16 %v2058_v40 }
  0xfd   :  { %v710_v63 = vsel %vm361_vm10, %v2055_v62, %v2059_v39 }
 0x102   :  { %2203 = vrot.lane.b32.xlu1 %v2202_v42, %s2722_s24  ;;  %v3249_v48 = vpop.permute.xlu0 %2062  ;;  %2208 = vrot.lane.b32.xlu2 %v2207_v6, %s2722_s24  ;;  %v709_v42 = vsel %vm361_vm10, %v2054_v23, %v2055_v62  ;;  %v2073_v8 = vpop.permute.xlu2 %2072 }
 0x103   :  { %v4014_v24 = vunpack.i.h.bf16 %v3249_v48  ;;  %v2217_v33 = vpack.i.bf16 %v710_v63, %v709_v42  ;;  %v2075_v55 = vunpack.i.h.bf16 %v2073_v8  ;;  %v2074_v43 = vunpack.i.l.bf16 %v2073_v8 }
 0x104   :  { %v2060_v42 = vunpack.i.h.bf16 %v2058_v40  ;;  %v2064_v13 = vunpack.i.l.bf16 %v3249_v48  ;;  %v4073_v49 = vunpack.i.h.bf16 %v3249_v48 }
 0x105   :  { %v3259_v17 = vsel %vm798_vm15, %v4014_v24, %v2069_v35  ;;  %v3269_v25 = vsel %vm798_vm15, %v2074_v43, %v2075_v55 }
 0x106   :  { %v799_v2 = vsel %vm798_vm15, %v2064_v13, %v4073_v49 }
 0x10a   :  { %v2078_v29 = vpop.permute.xlu0 %2077  ;;  %2218 = vrot.lane.b32.xlu2 %v2217_v33, %s2722_s24  ;;  %v2088_v62 = vpop.permute.xlu2 %2087  ;;  %v3275_v33 = vsel %vm361_vm10, %v2059_v39, %v2060_v42 }
 0x10b   :  { %v2080_v26 = vunpack.i.h.bf16 %v2078_v29  ;;  %v2079_v6 = vunpack.i.l.bf16 %v2078_v29  ;;  %v2090_v16 = vunpack.i.h.bf16 %v2088_v62  ;;  %v2089_v37 = vunpack.i.l.bf16 %v2088_v62 }
 0x10d   :  { %v803_v28 = vsel %vm798_vm15, %v2075_v55, %v2079_v6  ;;  %v804_v35 = vsel %vm798_vm15, %v2079_v6, %v2080_v26 }
 0x10e   :  { %v2212_v24 = vpack.i.bf16 %v804_v35, %v803_v28 }
 0x110   :  { %2213 = vrot.lane.b32.xlu1 %v2212_v24, %s2722_s24 }
 0x112   :  { %v2083_v23 = vpop.permute.xlu1 %2082 }
 0x113   :  { %v2085_v28 = vunpack.i.h.bf16 %v2083_v23  ;;  %v2084_v26 = vunpack.i.l.bf16 %v2083_v23 }
 0x114   :  { %v3272_v63 = vpop.permute.xlu2 %2092 }
 0x115   :  { %v658_v6 = vsel %vm652_vm11, %v2084_v26, %v2085_v28 }
 0x124   :  { %v3281_v58 = vpop.permute.xlu2 %2107 }
 0x12c   :  { %v3287_v39 = vpop.permute.xlu2 %2112 }
 0x12d   :  { %v2115_v62 = vunpack.i.h.bf16 %v3287_v39  ;;  %v4034_v21 = vunpack.i.l.bf16 %v3287_v39 }
 0x132   :  { %v3277_v29 = vpop.permute.xlu0 %2102 }
 0x134   :  { %v3279_v8 = vpop.permute.xlu1 %2097  ;;  %v3292_v38 = vpop.permute.xlu2 %2122 }
 0x13a   :  { %v2148_v43 = vpop.permute.xlu0 %2147 }
 0x13b   :  { %v2150_v55 = vunpack.i.h.bf16 %v2148_v43 }
 0x13c   :  { %v3283_v24 = vpop.permute.xlu1 %2117  ;;  %v3298_v31 = vpop.permute.xlu2 %2132 }
 0x13d   :  { %v657_v40 = vsel %vm652_vm11, %v2150_v55, %v2084_v26 }
 0x13e   :  { %v2232_v35 = vpack.i.bf16 %v658_v6, %v657_v40  ;;  %v689_v6 = vsel %vm683_vm0, %v2089_v37, %v2090_v16 }
 0x140   :  { %2233 = vrot.lane.b32.xlu2 %v2232_v35, %s2722_s24 }
 0x142   :  { %v3294_v9 = vpop.permute.xlu0 %2152 }
 0x144   :  { %v3290_v42 = vpop.permute.xlu1 %2127 }
 0x14a   :  { %v3303_v26 = vpop.permute.xlu0 %2162 }
 0x14c   :  { %v3296_v23 = vpop.permute.xlu1 %2137 }
 0x152   :  { %v2173_v16 = vpop.permute.xlu0 %2172 }
 0x153   :  { %v2175_v3 = vunpack.i.h.bf16 %v2173_v16  ;;  %v2174_v14 = vunpack.i.l.bf16 %v2173_v16 }
 0x154   :  { %v3300_v44 = vpop.permute.xlu1 %2157 }
 0x155   :  { %v4027_v28 = vunpack.i.h.bf16 %v3300_v44  ;;  %v833_v13 = vsel %vm829_vm1, %v2174_v14, %v2175_v3  ;;  %v2100_v14 = vunpack.i.h.bf16 %v3279_v8 }
 0x157   :  { %v688_v40 = vsel %vm683_vm0, %v4027_v28, %v2089_v37  ;;  %v832_v28 = vsel %vm829_vm1, %v4034_v21, %v2115_v62  ;;  %v2143_v37 = vpop.permute.xlu2 %2142 }
 0x158   :  { %v2227_v35 = vpack.i.bf16 %v689_v6, %v688_v40  ;;  %v2237_v40 = vpack.i.bf16 %v799_v2, %v832_v28  ;;  %v2145_v6 = vunpack.i.h.bf16 %v2143_v37  ;;  %v2144_v61 = vunpack.i.l.bf16 %v2143_v37 }
 0x15a   :  { %2228 = vrot.lane.b32.xlu1 %v2227_v35, %s2722_s24  ;;  %v2149_v35 = vunpack.i.l.bf16 %v2148_v43  ;;  %v655_v48 = vsel %vm652_vm11, %v2144_v61, %v2145_v6  ;;  %v3327_v56 = vpop.permute.xlu0 %2183 }
 0x15c   :  { %v2168_v52 = vpop.permute.xlu1 %2167  ;;  %v656_v49 = vsel %vm652_vm11, %v2149_v35, %v2150_v55 }
 0x15d   :  { %v2252_v28 = vpack.i.bf16 %v656_v49, %v655_v48  ;;  %v2170_v43 = vunpack.i.h.bf16 %v2168_v52  ;;  %v2169_v21 = vunpack.i.l.bf16 %v2168_v52  ;;  %v2186_v52 = vunpack.i.h.bf16 %v3327_v56 }
 0x15f   :  { %v771_v35 = vsel %vm767_vm3, %v2169_v21, %v2170_v43  ;;  %v2140_v21 = vunpack.i.h.bf16 %v3296_v23 }
 0x162   :  { %2238 = vrot.lane.b32.xlu1 %v2237_v40, %s2722_s24  ;;  %v2165_v40 = vunpack.i.h.bf16 %v3303_v26 }
 0x164   :  { %v2178_v20 = vpop.permute.xlu1 %2177 }
 0x165   :  { %v2180_v36 = vunpack.i.h.bf16 %v2178_v20  ;;  %v2179_v7 = vunpack.i.l.bf16 %v2178_v20  ;;  %v2099_v20 = vunpack.i.l.bf16 %v3279_v8 }
 0x167   :  { %v835_v62 = vsel %vm829_vm1, %v2179_v7, %v2180_v36  ;;  %v834_v2 = vsel %vm829_vm1, %v2175_v3, %v2179_v7  ;;  %v2120_v7 = vunpack.i.h.bf16 %v3283_v24  ;;  %v2119_v3 = vunpack.i.l.bf16 %v3283_v24 }
 0x168   :  { %v2222_v37 = vpack.i.bf16 %v3269_v25, %v835_v62  ;;  %v2257_v16 = vpack.i.bf16 %v834_v2, %v833_v13  ;;  %v2109_v36 = vunpack.i.l.bf16 %v3281_v58  ;;  %v741_v6 = vsel %vm736_vm2, %v2165_v40, %v2099_v20 }
 0x169   :  { %v654_v8 = vsel %vm652_vm11, %v2120_v7, %v2144_v61  ;;  %v742_v48 = vsel %vm736_vm2, %v2099_v20, %v2100_v14  ;;  %v653_v13 = vsel %vm652_vm11, %v2119_v3, %v2120_v7  ;;  %v2105_v62 = vunpack.i.h.bf16 %v3277_v29 }
 0x16a   :  { %2253 = vrot.lane.b32.xlu1 %v2252_v28, %s2722_s24  ;;  %2223 = vrot.lane.b32.xlu0 %v2222_v37, %s2722_s24  ;;  %v772_v24 = vsel %vm767_vm3, %v2170_v43, %v2109_v36  ;;  %v2130_v2 = vunpack.i.h.bf16 %v3290_v42  ;;  %v2277_v28 = vpack.i.bf16 %v742_v48, %v741_v6  ;;  %v2242_v37 = vpack.i.bf16 %v654_v8, %v653_v13 }
 0x16b   :  { %2258 = vrot.lane.b32.xlu2 %v2257_v16, %s2722_s24  ;;  %v2129_v61 = vunpack.i.l.bf16 %v3290_v42  ;;  %v2139_v16 = vunpack.i.l.bf16 %v3296_v23  ;;  %v2262_v43 = vpack.i.bf16 %v772_v24, %v771_v35  ;;  %v2104_v14 = vunpack.i.l.bf16 %v3277_v29 }
 0x16c   :  { %v3337_v25 = vpop.permute.xlu1 %2188  ;;  %v4074_v42 = vunpack.i.l.bf16 %v3287_v39  ;;  %v2125_v8 = vunpack.i.h.bf16 %v3292_v38  ;;  %v2124_v35 = vunpack.i.l.bf16 %v3292_v38  ;;  %v2164_v29 = vunpack.i.l.bf16 %v3303_v26 }
 0x16d   :  { %v2190_v55 = vunpack.i.l.bf16 %v3337_v25  ;;  %v737_v20 = vsel %vm736_vm2, %v2129_v61, %v2130_v2  ;;  %v770_v7 = vsel %vm767_vm3, %v2104_v14, %v2105_v62  ;;  %v830_v3 = vsel %vm829_vm1, %v2139_v16, %v2140_v21 }
 0x16e   :  { %v2292_v23 = vpack.i.bf16 %v737_v20, %v770_v7  ;;  %v2050_v24 = vunpack.i.h.bf16 %v3228_v54  ;;  %v2110_v48 = vunpack.i.h.bf16 %v3281_v58  ;;  %v4075_v39 = vpack.i.bf16 %v3254_v27, %v3259_v17 }
 0x16f   :  { %v3350_v49 = vsel %vm574_vm14, %v2186_v52, %v2190_v55  ;;  %v831_v55 = vsel %vm829_vm1, %v2140_v21, %v4074_v42  ;;  %v2095_v13 = vunpack.i.h.bf16 %v3272_v63  ;;  %v2094_v62 = vunpack.i.l.bf16 %v3272_v63 }
 0x170   :  { %v2247_v6 = vpack.i.bf16 %v831_v55, %v830_v3  ;;  %v684_v38 = vsel %vm683_vm0, %v2124_v35, %v2125_v8  ;;  %v740_v26 = vsel %vm736_vm2, %v2164_v29, %v2165_v40  ;;  %v773_v58 = vsel %vm767_vm3, %v2109_v36, %v2110_v48  ;;  %v3454_v48 = vpop.permute.xlu0 %2198 }
 0x171   :  { %v2272_v16 = vpack.i.bf16 %v740_v26, %v773_v58  ;;  %v739_v27 = vsel %vm736_vm2, %v2094_v62, %v2095_v13  ;;  %v2159_v17 = vunpack.i.l.bf16 %v3300_v44  ;;  %v2155_v63 = vunpack.i.h.bf16 %v3294_v9 }
 0x172   :  { %2278 = vrot.lane.b32.xlu1 %v2277_v28, %s2722_s24  ;;  %2243 = vrot.lane.b32.xlu0 %v2242_v37, %s2722_s24  ;;  %v738_v28 = vsel %vm736_vm2, %v2130_v2, %v2094_v62  ;;  %v4076_v37 = vunpack.i.l.bf16 %v3228_v54  ;;  %v2154_v20 = vunpack.i.l.bf16 %v3294_v9  ;;  %v4077_v54 = vunpack.i.h.bf16 %v3300_v44 }
 0x173   :  { %2263 = vrot.lane.b32.xlu2 %v2262_v43, %s2722_s24  ;;  %v2297_v43 = vpack.i.bf16 %v739_v27, %v738_v28  ;;  %v2135_v3 = vunpack.i.h.bf16 %v3298_v31  ;;  %v2134_v9 = vunpack.i.l.bf16 %v3298_v31  ;;  %v4078_v55 = vpack.i.bf16 %v3102_v12, %v3104_v22  ;;  %v3419_v12 = vpop.permute.xlu2 %838 }
 0x174   :  { %v708_v61 = vsel %vm361_vm10, %v4076_v37, %v2050_v24  ;;  %v687_v40 = vsel %vm683_vm0, %v2159_v17, %v4077_v54  ;;  %v685_v36 = vsel %vm683_vm0, %v2125_v8, %v2154_v20  ;;  %v686_v2 = vsel %vm683_vm0, %v2154_v20, %v2155_v63 }
 0x175   :  { %v2307_v21 = vpack.i.bf16 %v684_v38, %v708_v61  ;;  %v2282_v7 = vpack.i.bf16 %v687_v40, %v3275_v33  ;;  %v2312_v42 = vpack.i.bf16 %v686_v2, %v685_v36  ;;  %v768_v44 = vsel %vm767_vm3, %v2134_v9, %v2135_v3 }
 0x176   :  { %v4079_v33 = vpack.i.bf16 %v2969_v4, %v2993_v51  ;;  %v4080_v31 = vpack.i.bf16 %v3049_v46, %v3025_v53  ;;  %v4081_v22 = vpack.i.bf16 %v2944_v18, %v2929_v11  ;;  %v4083_v4 = vpack.i.bf16 %v2973_v57, %v2960_v32  ;;  %v3433_v51 = vld [vmem:[#allocation2 + $0x30] sm:$0xff] }
 0x177   :  { %v2322_v53 = vpack.i.bf16 %v3433_v51, %v3433_v51  ;;  %v4084_v11 = vpack.i.bf16 %v3092_v34, %v3096_v15 }
 0x17a   :  { %2293 = vrot.lane.b32.xlu1 %v2292_v23, %s2722_s24  ;;  %2248 = vrot.lane.b32.xlu0 %v2247_v6, %s2722_s24  ;;  %v769_v23 = vsel %vm767_vm3, %v2135_v3, %v2104_v14  ;;  %v4082_v14 = vpack.i.bf16 %v3242_v5, %v3237_v0  ;;  %v3451_v0 = vpop.permute.xlu1 %2203 }
 0x17b   :  { %2268 = vrot.lane.b32.xlu2 %v4075_v39, %s2722_s24  ;;  %v2287_v6 = vpack.i.bf16 %v769_v23, %v768_v44  ;;  %v3438_v46 = vpop.permute.xlu2 %2193 }
 0x182   :  { %2308 = vrot.lane.b32.xlu1 %v2307_v21, %s2722_s24  ;;  %2273 = vrot.lane.b32.xlu0 %v2272_v16, %s2722_s24  ;;  %v2214_v24 = vpop.permute.xlu1 %2213 }
 0x183   :  { %2298 = vrot.lane.b32.xlu2 %v2297_v43, %s2722_s24  ;;  %v3444_v18 = vpop.permute.xlu2 %2208  ;;  %v2216_v39 = vunpack.i.h.bf16 %v2214_v24  ;;  %v2215_v13 = vunpack.i.l.bf16 %v2214_v24 }
 0x185   :  { %v986_v27 = vsel %vm574_vm14, %v2215_v13, %v2216_v39 }
 0x18a   :  { %2318 = vrot.lane.b32.xlu1 %v4078_v55, %s2729_s30  ;;  %2283 = vrot.lane.b32.xlu0 %v2282_v7, %s2722_s24 }
 0x18b   :  { %2313 = vrot.lane.b32.xlu2 %v2312_v42, %s2722_s24  ;;  %v3447_v32 = vpop.permute.xlu2 %2218 }
 0x192   :  { %2333 = vrot.lane.b32.xlu1 %v4079_v33, %s2726_s28  ;;  %2288 = vrot.lane.b32.xlu0 %v2287_v6, %s2722_s24  ;;  %v2221_v6 = vunpack.i.h.bf16 %v3447_v32  ;;  %v2220_v33 = vunpack.i.l.bf16 %v3447_v32 }
 0x193   :  { %2328 = vrot.lane.b32.xlu2 %v4080_v31, %s2727_s29 }
 0x19a   :  { %2353 = vrot.lane.b32.xlu1 %v4081_v22, %s2726_s28  ;;  %2303 = vrot.lane.b32.xlu0 %v4082_v14, %s2722_s24  ;;  %v3449_v57 = vpop.permute.xlu2 %2233 }
 0x19b   :  { %2348 = vrot.lane.b32.xlu2 %v4083_v4, %s2727_s29 }
 0x1a2   :  { %2323 = vrot.lane.b32.xlu0 %v2322_v53, %s2723_s25 }
 0x1aa   :  { %2338 = vrot.lane.b32.xlu0 %v4084_v11, %s2729_s30 }
 0x1b2   :  { %2343 = vrot.lane.b32.xlu0 %v2322_v53, %s2723_s25 }
 0x1c5   :  { %v2259_v5 = vpop.permute.xlu2 %2258 }
 0x1c6   :  { %v2261_v8 = vunpack.i.h.bf16 %v2259_v5  ;;  %v2260_v35 = vunpack.i.l.bf16 %v2259_v5 }
 0x1c8   :  { %v989_v29 = vsel %vm574_vm14, %v2260_v35, %v2261_v8 }
 0x1c9   :  { %1078 = vmatpush.msra.mxu2 %v989_v29 }
 0x1cc   :  { %v3456_v15 = vpop.permute.xlu1 %2228 }
 0x1cd   :  { %v2264_v34 = vpop.permute.xlu2 %2263  ;;  %v2231_v29 = vunpack.i.h.bf16 %v3456_v15  ;;  %v2230_v24 = vunpack.i.l.bf16 %v3456_v15  ;;  %v2211_v15 = vunpack.i.h.bf16 %v3444_v18 }
 0x1ce   :  { %v2266_v38 = vunpack.i.h.bf16 %v2264_v34  ;;  %v2265_v26 = vunpack.i.l.bf16 %v2264_v34 }
 0x1d0   :  { %v981_v16 = vsel %vm574_vm14, %v2265_v26, %v2266_v38  ;;  %v2236_v26 = vunpack.i.h.bf16 %v3449_v57 }
 0x1d4   :  { %v2239_v61 = vpop.permute.xlu1 %2238 }
 0x1d5   :  { %v2269_v63 = vpop.permute.xlu2 %2268  ;;  %v2241_v20 = vunpack.i.h.bf16 %v2239_v61  ;;  %v2240_v54 = vunpack.i.l.bf16 %v2239_v61 }
 0x1d6   :  { %v2271_v36 = vunpack.i.h.bf16 %v2269_v63  ;;  %v2270_v2 = vunpack.i.l.bf16 %v2269_v63  ;;  %v970_v63 = vsel %vm574_vm14, %v2230_v24, %v2231_v29 }
 0x1d8   :  { %v983_v55 = vsel %vm574_vm14, %v2241_v20, %v2270_v2  ;;  %v984_v44 = vsel %vm574_vm14, %v2270_v2, %v2271_v36  ;;  %v2195_v20 = vunpack.i.l.bf16 %v3438_v46  ;;  %v42_v2 = vld [vmem:[#allocation6] sm:$0xff] }
 0x1dc   :  { %v2224_v62 = vpop.permute.xlu0 %2223  ;;  %v3464_v43 = vpop.permute.xlu1 %2253 }
 0x1dd   :  { %v2226_v28 = vunpack.i.h.bf16 %v2224_v62  ;;  %v2225_v37 = vunpack.i.l.bf16 %v2224_v62  ;;  %v2256_v34 = vunpack.i.h.bf16 %v3464_v43  ;;  %v2206_v62 = vunpack.i.h.bf16 %v3451_v0 }
 0x1df   :  { %v985_v58 = vsel %vm574_vm14, %v2226_v28, %v2215_v13  ;;  %v990_v21 = vsel %vm574_vm14, %v2261_v8, %v2225_v37  ;;  %v973_v8 = vsel %vm574_vm14, %v2220_v33, %v2221_v6  ;;  %v2235_v28 = vunpack.i.l.bf16 %v3449_v57  ;;  %v2299_v37 = vpop.permute.xlu2 %2298 }
 0x1e0   :  { %1079 = vmatpush.msra.mxu2 %v985_v58  ;;  %1098 = vmatpush.msra.mxu3 %v990_v21  ;;  %v2191_v21 = vunpack.i.h.bf16 %v3337_v25 }
 0x1e2   :  { %1080 = vmatpush.msra.mxu2 %v981_v16  ;;  %1099 = vmatpush.msra.mxu3 %v986_v27  ;;  %v965_v27 = vsel %vm574_vm14, %v2256_v34, %v2235_v28 }
 0x1e4   :  { %v3462_v17 = vpop.permute.xlu0 %2243  ;;  %v2279_v23 = vpop.permute.xlu1 %2278 }
 0x1e5   :  { %v2281_v22 = vunpack.i.h.bf16 %v2279_v23  ;;  %v2280_v14 = vunpack.i.l.bf16 %v2279_v23 }
 0x1e7   :  { %v978_v35 = vsel %vm574_vm14, %v2280_v14, %v2281_v22  ;;  %v2314_v33 = vpop.permute.xlu2 %2313 }
 0x1ec   :  { %v2249_v40 = vpop.permute.xlu0 %2248  ;;  %v2294_v16 = vpop.permute.xlu1 %2293 }
 0x1ed   :  { %v2251_v7 = vunpack.i.h.bf16 %v2249_v40  ;;  %v2250_v3 = vunpack.i.l.bf16 %v2249_v40  ;;  %v2196_v40 = vunpack.i.h.bf16 %v3438_v46 }
 0x1ef   :  { %v987_v9 = vsel %vm574_vm14, %v2250_v3, %v2251_v7  ;;  %v988_v42 = vsel %vm574_vm14, %v2251_v7, %v2240_v54  ;;  %v966_v54 = vsel %vm574_vm14, %v2235_v28, %v2236_v26  ;;  %v2296_v7 = vunpack.i.h.bf16 %v2294_v16 }
 0x1f0   :  { %1038 = vmatpush.msra.mxu0 %v987_v9  ;;  %1058 = vmatpush.msra.mxu1 %v988_v42  ;;  %v2295_v3 = vunpack.i.l.bf16 %v2294_v16  ;;  %v2255_v26 = vunpack.i.l.bf16 %v3464_v43 }
 0x1f2   :  { %1039 = vmatpush.msra.mxu0 %v983_v55  ;;  %1059 = vmatpush.msra.mxu1 %v984_v44  ;;  %v2301_v55 = vunpack.i.h.bf16 %v2299_v37  ;;  %v2300_v44 = vunpack.i.l.bf16 %v2299_v37 }
 0x1f4   :  { %v2274_v31 = vpop.permute.xlu0 %2273  ;;  %v2309_v22 = vpop.permute.xlu1 %2308 }
 0x1f5   :  { %v2276_v4 = vunpack.i.h.bf16 %v2274_v31  ;;  %v2275_v53 = vunpack.i.l.bf16 %v2274_v31  ;;  %v975_v31 = vsel %vm574_vm14, %v2296_v7, %v2300_v44 }
 0x1f7   :  { %v977_v11 = vsel %vm574_vm14, %v2276_v4, %v2280_v14  ;;  %v982_v5 = vsel %vm574_vm14, %v2266_v38, %v2275_v53  ;;  %v2210_v38 = vunpack.i.l.bf16 %v3444_v18  ;;  %v957_v18 = vsel %vm574_vm14, %v2191_v21, %v2195_v20 }
 0x1f8   :  { %1081 = vmatpush.msra.mxu2 %v977_v11  ;;  %1100 = vmatpush.msra.mxu3 %v982_v5  ;;  %v976_v14 = vsel %vm574_vm14, %v2300_v44, %v2301_v55  ;;  %v2316_v4 = vunpack.i.h.bf16 %v2314_v33  ;;  %v2315_v53 = vunpack.i.l.bf16 %v2314_v33  ;;  %v2311_v5 = vunpack.i.h.bf16 %v2309_v22  ;;  %v4087_v33 = vld [vmem:[#allocation24_spill] sm:$0xff] }
 0x1f9   :  { %v961_v57 = vsel %vm574_vm14, %v2206_v62, %v2210_v38  ;;  %v962_v36 = vsel %vm574_vm14, %v2210_v38, %v2211_v15  ;;  %v2200_v62 = vunpack.i.l.bf16 %v3454_v48  ;;  %v2205_v38 = vunpack.i.l.bf16 %v3451_v0 }
 0x1fa   :  { %1082 = vmatpush.msra.mxu2 %v973_v8  ;;  %1101 = vmatpush.msra.mxu3 %v978_v35  ;;  %v2310_v8 = vunpack.i.l.bf16 %v2309_v22  ;;  %v967_v28 = vsel %vm574_vm14, %v2311_v5, %v2315_v53  ;;  %v968_v37 = vsel %vm574_vm14, %v2315_v53, %v2316_v4  ;;  %v1136_v55 = vmul.f32 %v3433_v51, %v2912_v60  ;;  %v4089_v60 = vld [vmem:[#allocation20_spill] sm:$0xff]  ;;  %v4090_v4 = vld [vmem:[#allocation23_spill] sm:$0xff] }
 0x1fb   :  { %v1144_v53 = vmul.f32 %v3433_v51, %v4090_v4 }
 0x1fc   :  { %v2284_v32 = vpop.permute.xlu0 %2283 }
 0x1fd   :  { %v2286_v39 = vunpack.i.h.bf16 %v2284_v32  ;;  %v2285_v13 = vunpack.i.l.bf16 %v2284_v32  ;;  %v2246_v32 = vunpack.i.h.bf16 %v3462_v17 }
 0x1ff   :  { %v969_v61 = vsel %vm574_vm14, %v2286_v39, %v2230_v24  ;;  %v974_v58 = vsel %vm574_vm14, %v2221_v6, %v2285_v13  ;;  %v958_v6 = vsel %vm574_vm14, %v2195_v20, %v2196_v40  ;;  %v2245_v24 = vunpack.i.l.bf16 %v3462_v17 }
 0x200   :  { %1083 = vmatpush.msra.mxu2 %v969_v61  ;;  %1102 = vmatpush.msra.mxu3 %v974_v58  ;;  %v2201_v13 = vunpack.i.h.bf16 %v3454_v48  ;;  %v2185_v17 = vunpack.i.l.bf16 %v3327_v56  ;;  %v964_v58 = vsel %vm574_vm14, %v2246_v32, %v2255_v26 }
 0x201   :  { %v963_v61 = vsel %vm574_vm14, %v2245_v24, %v2246_v32  ;;  %v4092_v32 = vld [vmem:[#allocation26_spill] sm:$0xff] }
 0x202   :  { %1084 = vmatpush.msra.mxu2 %v965_v27  ;;  %1103 = vmatpush.msra.mxu3 %v970_v63  ;;  %v959_v48 = vsel %vm574_vm14, %v2200_v62, %v2201_v13  ;;  %v960_v0 = vsel %vm574_vm14, %v2201_v13, %v2205_v38  ;;  %v955_v43 = vsel %vm574_vm14, %v2185_v17, %v2186_v52  ;;  %v4094_v13 = vld [vmem:[#allocation18_spill] sm:$0xff]  ;;  %v4095_v38 = vld [vmem:[#allocation25_spill] sm:$0xff] }
 0x204   :  { %v2289_v25 = vpop.permute.xlu0 %2288  ;;  %1085 = vmatpush.msra.mxu2 %v961_v57  ;;  %1104 = vmatpush.msra.mxu3 %v966_v54 }
 0x205   :  { %v2291_v9 = vunpack.i.h.bf16 %v2289_v25  ;;  %v2290_v42 = vunpack.i.l.bf16 %v2289_v25 }
 0x206   :  { %1086 = vmatpush.msra.mxu2 %v957_v18  ;;  %1105 = vmatpush.msra.mxu3 %v962_v36 }
 0x207   :  { %1869 = vmatmul.msk.f32.vlgmr.msra.gmra.mxu2 %vm1027_vm4, %v42_v2  ;;  %v979_v46 = vsel %vm574_vm14, %v2290_v42, %v2291_v9  ;;  %v980_v23 = vsel %vm574_vm14, %v2291_v9, %v2295_v3 }
 0x208   :  { %1040 = vmatpush.msra.mxu0 %v979_v46  ;;  %1060 = vmatpush.msra.mxu1 %v980_v23 }
 0x209   :  { %1106 = vmatpush.msra.mxu3 %v958_v6 }
 0x20a   :  { %1870 = vmatmul.msk.f32.vlgmr.msra.gmra.mxu3 %vm1027_vm4, %v42_v2  ;;  %1041 = vmatpush.msra.mxu0 %v975_v31  ;;  %v4088_v31 = vld [vmem:[#allocation28_spill] sm:$0xff] }
 0x20b   :  { %1061 = vmatpush.msra.mxu1 %v976_v14  ;;  %v1141_v22 = vmul.f32 %v3433_v51, %v4088_v31  ;;  %v1133_v14 = vmul.f32 %v3433_v51, %v4089_v60 }
 0x20c   :  { %v2304_v11 = vpop.permute.xlu0 %2303 }
 0x20d   :  { %v2306_v35 = vunpack.i.h.bf16 %v2304_v11  ;;  %v2305_v29 = vunpack.i.l.bf16 %v2304_v11 }
 0x20f   :  { %v971_v34 = vsel %vm574_vm14, %v2305_v29, %v2306_v35  ;;  %v972_v39 = vsel %vm574_vm14, %v2306_v35, %v2310_v8  ;;  %v4091_v35 = vld [vmem:[#allocation27_spill] sm:$0xff] }
 0x210   :  { %1042 = vmatpush.msra.mxu0 %v971_v34  ;;  %1062 = vmatpush.msra.mxu1 %v972_v39  ;;  %v4093_v34 = vld [vmem:[#allocation31_spill] sm:$0xff] }
 0x212   :  { %1043 = vmatpush.msra.mxu0 %v967_v28  ;;  %1063 = vmatpush.msra.mxu1 %v968_v37  ;;  %v4096_v28 = vld [vmem:[#allocation17_spill] sm:$0xff] }
 0x214   :  { %1044 = vmatpush.msra.mxu0 %v963_v61  ;;  %1064 = vmatpush.msra.mxu1 %v964_v58 }
 0x216   :  { %1045 = vmatpush.msra.mxu0 %v959_v48  ;;  %1065 = vmatpush.msra.mxu1 %v960_v0 }
 0x218   :  { %1046 = vmatpush.msra.mxu0 %v955_v43  ;;  %1066 = vmatpush.msra.mxu1 %v3350_v49  ;;  %v3537_v49 = vmul.f32 %v3433_v51, %v2867_v41  ;;  %v4097_v43 = vld [vmem:[#allocation15_spill] sm:$0xff] }
 0x219   :  { %1867 = vmatmul.msk.f32.vlgmr.msra.gmra.mxu0 %vm1027_vm4, %v42_v2  ;;  %1868 = vmatmul.msk.f32.vlgmr.msra.gmra.mxu1 %vm1027_vm4, %v42_v2 }
 0x28a   :  { %v1088_v21 = vpop.f32.mrf.mxu2 }
 0x28b   :  { %v1089_v15 = vadd.f32 %v1088_v21, %v3419_v12 }
 0x28d   :  { %v3524_v16 = vmax.f32 %v1089_v15, 0.0  ;;  %v1108_v27 = vpop.f32.mrf.mxu3  ;;  %v4098_v15 = vld [vmem:[#allocation21_spill] sm:$0xff] }
 0x28e   :  { %v1109_v63 = vadd.f32 %v1108_v27, %v3419_v12 }
 0x28f   :  { %1117 = vst [vmem:[#allocation2 + $0x8] sm:$0xff] %v3524_v16  ;;  %v3533_v52 = vmul.f32 %v3524_v16, %v3086_v30  ;;  %v3549_v54 = vmul.f32 %v3524_v16, %v3176_v59  ;;  %v2417_v0 = vpack.i.bf16 %v3524_v16, %v3433_v51  ;;  %v1138_v27 = vmul.f32 %v3524_v16, %v4098_v15 }
 0x290   :  { %v3528_v56 = vmax.f32 %v1109_v63, 0.0  ;;  %v4099_v63 = vld [vmem:[#allocation14_spill] sm:$0xff] }
 0x292   :  { %1118 = vst [vmem:[#allocation2 + $0x20] sm:$0xff] %v3528_v56  ;;  %v3541_v20 = vmul.f32 %v3528_v56, %v2986_v10  ;;  %v3545_v57 = vmul.f32 %v3528_v56, %v2883_v47  ;;  %v3553_v30 = vmul.f32 %v3528_v56, %v3030_v45  ;;  %v2422_v48 = vpack.i.bf16 %v3433_v51, %v3528_v56 }
 0x293   :  { %v1139_v21 = vmul.f32 %v3528_v56, %v4097_v43 }
 0x294   :  { %v2472_v41 = vpack.i.bf16 %v3541_v20, %v3533_v52  ;;  %v2457_v40 = vpack.i.bf16 %v3537_v49, %v3545_v57  ;;  %v2467_v10 = vpack.i.bf16 %v3553_v30, %v3549_v54  ;;  %v3654_v49 = vpop.permute.xlu1 %2318 }
 0x296   :  { %v1048_v25 = vpop.f32.mrf.mxu0  ;;  %v1068_v47 = vpop.f32.mrf.mxu1 }
 0x297   :  { %v1049_v18 = vadd.f32 %v1048_v25, %v3419_v12  ;;  %v1069_v59 = vadd.f32 %v1068_v47, %v3419_v12  ;;  %v1140_v25 = vmul.f32 %v3433_v51, %v4099_v63  ;;  %v4100_v47 = vld [vmem:[#allocation22_spill] sm:$0xff] }
 0x299   :  { %v1111_v36 = vmax.f32 %v1049_v18, 0.0  ;;  %v1112_v2 = vmax.f32 %v1069_v59, 0.0  ;;  %v1137_v18 = vmul.f32 %v3433_v51, %v4100_v47  ;;  %v2447_v59 = vpack.i.bf16 %v1140_v25, %v1139_v21 }
 0x29b   :  { %1115 = vst [vmem:[#allocation2 + $0x18] sm:$0xff] %v1111_v36  ;;  %v2362_v45 = vpack.i.bf16 %v3433_v51, %v1112_v2  ;;  %v2377_v7 = vpack.i.bf16 %v1112_v2, %v1111_v36  ;;  %v2357_v3 = vpack.i.bf16 %v1111_v36, %v3433_v51  ;;  %v1135_v9 = vmul.f32 %v1112_v2, %v2841_v1  ;;  %v4085_v1 = vld [vmem:[#allocation29_spill] sm:$0xff] }
 0x29c   :  { %1116 = vst [vmem:[#allocation2 + $0x10] sm:$0xff] %v1112_v2  ;;  %v3570_v42 = vmul.f32 %v1111_v36, %v2894_v50  ;;  %v3573_v12 = vmul.f32 %v1112_v2, %v3217_v19  ;;  %v1142_v23 = vmul.f32 %v1111_v36, %v4085_v1  ;;  %v4086_v50 = vld [vmem:[#allocation19_spill] sm:$0xff]  ;;  %v1143_v19 = vmul.f32 %v1112_v2, %v4087_v33  ;;  %v3646_v33 = vpop.permute.xlu0 %2323  ;;  %v3667_v60 = vpop.permute.xlu1 %2333 }
 0x29d   :  { %2363 = vrot.lane.b32.xlu1 %v2362_v45, %s2719_s21  ;;  %2378 = vrot.lane.b32.xlu2 %v2377_v7, %s2723_s25  ;;  %v2387_v46 = vpack.i.bf16 %v1136_v55, %v1135_v9  ;;  %v1134_v6 = vmul.f32 %v1111_v36, %v4086_v50  ;;  %v1174_v29 = vmul.f32 %v1111_v36, %v4091_v35  ;;  %v4102_v7 = vld [vmem:[#allocation35_spill] sm:$0xff]  ;;  %v4103_v9 = vld [vmem:[#allocation32_spill] sm:$0xff] }
 0x29e   :  { %2358 = vrot.lane.b32.xlu0 %v2357_v3, %s2719_s21  ;;  %v2602_v44 = vpack.i.bf16 %v3573_v12, %v3570_v42  ;;  %v2392_v11 = vpack.i.bf16 %v1142_v23, %v1141_v22  ;;  %v2397_v8 = vpack.i.bf16 %v1144_v53, %v1143_v19  ;;  %v1175_v24 = vmul.f32 %v1112_v2, %v4092_v32  ;;  %v3648_v19 = vpop.permute.xlu2 %2328 }
 0x29f   :  { %v2382_v5 = vpack.i.bf16 %v1134_v6, %v1133_v14  ;;  %v1166_v39 = vmul.f32 %v1111_v36, %v4093_v34  ;;  %v1167_v62 = vmul.f32 %v1112_v2, %v4094_v13  ;;  %v1158_v26 = vmul.f32 %v1111_v36, %v4095_v38 }
 0x2a0   :  { %v1159_v37 = vmul.f32 %v1112_v2, %v4096_v28  ;;  %v2402_v17 = vpack.i.bf16 %v1175_v24, %v1174_v29  ;;  %v2442_v36 = vpack.i.bf16 %v1138_v27, %v1137_v18  ;;  %v4101_v2 = vld [vmem:[#allocation33_spill] sm:$0xff]  ;;  %v1145_v55 = vmul.f32 %v3433_v51, %v4103_v9 }
 0x2a1   :  { %v2407_v61 = vpack.i.bf16 %v1167_v62, %v1166_v39  ;;  %v2432_v23 = vpack.i.bf16 %v3528_v56, %v3524_v16  ;;  %v4105_v39 = vld [vmem:[#allocation34_spill] sm:$0xff]  ;;  %v4106_v27 = vld [vmem:[#allocation37_spill] sm:$0xff] }
 0x2a2   :  { %v2412_v58 = vpack.i.bf16 %v1159_v37, %v1158_v26  ;;  %v3680_v13 = vmul.f32 %v3433_v51, %v4105_v39  ;;  %v3702_v63 = vmul.f32 %v3433_v51, %v4106_v27 }
 0x2a4   :  { %v3650_v31 = vpop.permute.xlu0 %2338  ;;  %v3670_v4 = vpop.permute.xlu1 %2353 }
 0x2a5   :  { %2373 = vrot.lane.b32.xlu1 %v2362_v45, %s2717_s0  ;;  %2388 = vrot.lane.b32.xlu2 %v2387_v46, %s2724_s26  ;;  %v1146_v45 = vmul.f32 %v3524_v16, %v4101_v2  ;;  %v4104_v46 = vld [vmem:[#allocation30_spill] sm:$0xff] }
 0x2a6   :  { %2368 = vrot.lane.b32.xlu0 %v2357_v3, %s2717_s0  ;;  %v1179_v3 = vmul.f32 %v3528_v56, %v4102_v7  ;;  %v1178_v1 = vmul.f32 %v3524_v16, %v4104_v46  ;;  %v3652_v22 = vpop.permute.xlu2 %2348 }
 0x2a7   :  { %v2452_v50 = vpack.i.bf16 %v1146_v45, %v1145_v55 }
 0x2a8   :  { %v2462_v6 = vpack.i.bf16 %v1179_v3, %v1178_v1 }
 0x2ac   :  { %v3656_v57 = vpop.permute.xlu0 %2343 }
 0x2ad   :  { %2393 = vrot.lane.b32.xlu2 %v2392_v11, %s2725_s27  ;;  %2383 = vrot.lane.b32.xlu1 %v2382_v5, %s2724_s26  ;;  %v2345_v54 = vunpack.i.l.bf16 %v3656_v57 }
 0x2ae   :  { %2398 = vrot.lane.b32.xlu0 %v2397_v8, %s2725_s27 }
 0x2b5   :  { %2403 = vrot.lane.b32.xlu2 %v2402_v17, %s2729_s30  ;;  %2408 = vrot.lane.b32.xlu1 %v2407_v61, %s2727_s29 }
 0x2b6   :  { %2413 = vrot.lane.b32.xlu0 %v2412_v58, %s2726_s28 }
 0x2bd   :  { %2418 = vrot.lane.b32.xlu2 %v2417_v0, %s2719_s21  ;;  %2438 = vrot.lane.b32.xlu1 %v2422_v48, %s2717_s0 }
 0x2be   :  { %2423 = vrot.lane.b32.xlu0 %v2422_v48, %s2719_s21 }
 0x2c5   :  { %2428 = vrot.lane.b32.xlu2 %v2417_v0, %s2717_s0  ;;  %2448 = vrot.lane.b32.xlu1 %v2447_v59, %s2724_s26 }
 0x2c6   :  { %2443 = vrot.lane.b32.xlu0 %v2442_v36, %s2724_s26 }
 0x2cd   :  { %2433 = vrot.lane.b32.xlu2 %v2432_v23, %s2723_s25  ;;  %2453 = vrot.lane.b32.xlu1 %v2452_v50, %s2725_s27 }
 0x2ce   :  { %2463 = vrot.lane.b32.xlu0 %v2462_v6, %s2729_s30 }
 0x2d5   :  { %2458 = vrot.lane.b32.xlu2 %v2457_v40, %s2725_s27  ;;  %2468 = vrot.lane.b32.xlu1 %v2467_v10, %s2727_s29 }
 0x2d6   :  { %2473 = vrot.lane.b32.xlu0 %v2472_v41, %s2726_s28 }
 0x2f7   :  { %v3659_v30 = vpop.permute.xlu2 %2378 }
 0x2f8   :  { %v2381_v40 = vunpack.i.h.bf16 %v3659_v30  ;;  %v2380_v52 = vunpack.i.l.bf16 %v3659_v30 }
 0x2fa   :  { %v1378_v20 = vsel %vm798_vm15, %v2380_v52, %v2381_v40  ;;  %v1379_v41 = vsel %vm798_vm15, %v2381_v40, %v2345_v54  ;;  %v2350_v40 = vunpack.i.l.bf16 %v3652_v22 }
 0x2fb   :  { %v2477_v10 = vpack.i.bf16 %v1379_v41, %v1378_v20  ;;  %v2325_v20 = vunpack.i.l.bf16 %v3646_v33 }
 0x2fd   :  { %2478 = vrot.lane.b32.xlu1 %v2477_v10, %s2722_s24 }
 0x2ff   :  { %v2389_v14 = vpop.permute.xlu2 %2388 }
 0x300   :  { %v2391_v36 = vunpack.i.h.bf16 %v2389_v14  ;;  %v2390_v2 = vunpack.i.l.bf16 %v2389_v14 }
 0x302   :  { %v3717_v1 = vsel %vm652_vm11, %v2390_v2, %v2391_v36 }
 0x307   :  { %v3672_v53 = vpop.permute.xlu2 %2393 }
 0x308   :  { %v2396_v11 = vunpack.i.h.bf16 %v3672_v53  ;;  %v2395_v5 = vunpack.i.l.bf16 %v3672_v53 }
 0x30a   :  { %v3688_v38 = vsel %vm683_vm0, %v2395_v5, %v2396_v11 }
 0x30f   :  { %v2364_v8 = vpop.permute.xlu1 %2363  ;;  %v3676_v35 = vpop.permute.xlu2 %2403 }
 0x310   :  { %v2365_v29 = vunpack.i.l.bf16 %v2364_v8  ;;  %v2359_v32 = vpop.permute.xlu0 %2358  ;;  %v2366_v45 = vunpack.i.h.bf16 %v2364_v8 }
 0x311   :  { %v2361_v24 = vunpack.i.h.bf16 %v2359_v32  ;;  %v2360_v34 = vunpack.i.l.bf16 %v2359_v32 }
 0x312   :  { %v3720_v23 = vsel %vm446_vm9, %v2365_v29, %v2366_v45  ;;  %v2406_v45 = vunpack.i.h.bf16 %v3676_v35 }
 0x313   :  { %v3683_v62 = vsel %vm446_vm9, %v2361_v24, %v2365_v29  ;;  %v3691_v26 = vsel %vm446_vm9, %v2360_v34, %v2361_v24  ;;  %v2356_v24 = vunpack.i.h.bf16 %v3670_v4 }
 0x314   :  { %v2582_v28 = vpack.i.bf16 %v3683_v62, %v3688_v38  ;;  %v2607_v37 = vpack.i.bf16 %v3680_v13, %v3691_v26 }
 0x317   :  { %v2374_v17 = vpop.permute.xlu1 %2373  ;;  %v3697_v61 = vpop.permute.xlu2 %2418 }
 0x318   :  { %v2376_v58 = vunpack.i.h.bf16 %v2374_v17  ;;  %v2375_v48 = vunpack.i.l.bf16 %v2374_v17  ;;  %v2369_v0 = vpop.permute.xlu0 %2368  ;;  %v2421_v34 = vunpack.i.h.bf16 %v3697_v61  ;;  %v4107_v17 = vld [vmem:[#allocation16_spill] sm:$0xff] }
 0x319   :  { %v2371_v43 = vunpack.i.h.bf16 %v2369_v0  ;;  %v2370_v21 = vunpack.i.l.bf16 %v2369_v0 }
 0x31a   :  { %v1289_v15 = vsel %vm361_vm10, %v2375_v48, %v2376_v58  ;;  %v1129_v58 = vmul.f32 %v3524_v16, %v4107_v17  ;;  %v2355_v16 = vunpack.i.l.bf16 %v3670_v4 }
 0x31b   :  { %v1288_v25 = vsel %vm361_vm10, %v2371_v43, %v2375_v48  ;;  %v3706_v47 = vsel %vm361_vm10, %v2370_v21, %v2371_v43 }
 0x31c   :  { %v2482_v18 = vpack.i.bf16 %v1289_v15, %v1288_v25  ;;  %v2572_v59 = vpack.i.bf16 %v3702_v63, %v3706_v47  ;;  %v2420_v15 = vunpack.i.l.bf16 %v3697_v61 }
 0x31e   :  { %2483 = vrot.lane.b32.xlu1 %v2482_v18, %s2722_s24  ;;  %v1208_v61 = vsel %vm446_vm9, %v2420_v15, %v2421_v34 }
 0x31f   :  { %v3711_v7 = vpop.permute.xlu2 %2428  ;;  %v2384_v3 = vpop.permute.xlu1 %2383 }
 0x320   :  { %v2399_v9 = vpop.permute.xlu0 %2398  ;;  %v2386_v51 = vunpack.i.h.bf16 %v2384_v3  ;;  %v2385_v55 = vunpack.i.l.bf16 %v2384_v3  ;;  %v2340_v3 = vunpack.i.l.bf16 %v3650_v31 }
 0x322   :  { %v3714_v46 = vsel %vm652_vm11, %v2386_v51, %v2390_v2  ;;  %v3723_v50 = vsel %vm652_vm11, %v2385_v55, %v2386_v51  ;;  %v2431_v55 = vunpack.i.h.bf16 %v3711_v7 }
 0x323   :  { %v2577_v6 = vpack.i.bf16 %v3717_v1, %v3714_v46  ;;  %v2587_v54 = vpack.i.bf16 %v3723_v50, %v3720_v23 }
 0x327   :  { %v3731_v41 = vpop.permute.xlu2 %2433  ;;  %v2409_v10 = vpop.permute.xlu1 %2408 }
 0x328   :  { %v2414_v14 = vpop.permute.xlu0 %2413  ;;  %v2436_v5 = vunpack.i.h.bf16 %v3731_v41  ;;  %v2435_v8 = vunpack.i.l.bf16 %v3731_v41  ;;  %v2411_v29 = vunpack.i.h.bf16 %v2409_v10  ;;  %v2410_v32 = vunpack.i.l.bf16 %v2409_v10 }
 0x329   :  { %v2415_v39 = vunpack.i.l.bf16 %v2414_v14  ;;  %v2416_v36 = vunpack.i.h.bf16 %v2414_v14  ;;  %v4108_v14 = vld [vmem:[#allocation36_spill] sm:$0xff] }
 0x32a   :  { %v1381_v48 = vsel %vm798_vm15, %v2435_v8, %v2436_v5  ;;  %v1382_v0 = vsel %vm798_vm15, %v2436_v5, %v2325_v20  ;;  %v1348_v43 = vsel %vm767_vm3, %v2410_v32, %v2411_v29  ;;  %v1349_v21 = vsel %vm767_vm3, %v2411_v29, %v2350_v40 }
 0x32b   :  { %v1317_v27 = vsel %vm736_vm2, %v2356_v24, %v2415_v39  ;;  %v2507_v25 = vpack.i.bf16 %v1382_v0, %v1381_v48  ;;  %v2487_v18 = vpack.i.bf16 %v1349_v21, %v1348_v43  ;;  %v1318_v10 = vsel %vm736_vm2, %v2415_v39, %v2416_v36 }
 0x32c   :  { %v2497_v2 = vpack.i.bf16 %v1129_v58, %v1317_v27  ;;  %v1319_v4 = vsel %vm736_vm2, %v2416_v36, %v2355_v16  ;;  %v1130_v5 = vmul.f32 %v3528_v56, %v4108_v14  ;;  %v1409_v24 = vsel %vm829_vm1, %v2406_v45, %v2340_v3 }
 0x32d   :  { %2508 = vrot.lane.b32.xlu0 %v2507_v25, %s2722_s24  ;;  %2488 = vrot.lane.b32.xlu1 %v2487_v18, %s2722_s24  ;;  %v2492_v48 = vpack.i.bf16 %v1319_v4, %v1318_v10  ;;  %v2401_v0 = vunpack.i.h.bf16 %v2399_v9  ;;  %v2400_v43 = vunpack.i.l.bf16 %v2399_v9  ;;  %v2351_v9 = vunpack.i.h.bf16 %v3652_v22 }
 0x32e   :  { %2498 = vrot.lane.b32.xlu2 %v2497_v2, %s2722_s24  ;;  %v2522_v17 = vpack.i.bf16 %v1208_v61, %v1130_v5  ;;  %v2405_v4 = vunpack.i.l.bf16 %v3676_v35  ;;  %v2330_v14 = vunpack.i.l.bf16 %v3648_v19  ;;  %v2326_v5 = vunpack.i.h.bf16 %v3646_v33 }
 0x32f   :  { %v3753_v51 = vpop.permute.xlu1 %2438  ;;  %v1266_v15 = vsel %vm683_vm0, %v2396_v11, %v2400_v43  ;;  %v1267_v27 = vsel %vm683_vm0, %v2400_v43, %v2401_v0  ;;  %v1347_v36 = vsel %vm767_vm3, %v2351_v9, %v2410_v32  ;;  %v2320_v11 = vunpack.i.l.bf16 %v3654_v49 }
 0x330   :  { %v3757_v40 = vpop.permute.xlu0 %2423  ;;  %v2440_v20 = vunpack.i.l.bf16 %v3753_v51  ;;  %v2502_v18 = vpack.i.bf16 %v1267_v27, %v1266_v15  ;;  %v2331_v32 = vunpack.i.h.bf16 %v3648_v19  ;;  %v1380_v35 = vsel %vm798_vm15, %v2326_v5, %v2435_v8 }
 0x331   :  { %v2425_v39 = vunpack.i.l.bf16 %v3757_v40  ;;  %v1408_v27 = vsel %vm829_vm1, %v2405_v4, %v2406_v45  ;;  %v2336_v45 = vunpack.i.h.bf16 %v3667_v60  ;;  %v2426_v26 = vunpack.i.h.bf16 %v3757_v40 }
 0x332   :  { %v1291_v29 = vsel %vm361_vm10, %v2431_v55, %v2440_v20 }
 0x333   :  { %v2512_v58 = vpack.i.bf16 %v1291_v29, %v1409_v24  ;;  %v1209_v25 = vsel %vm446_vm9, %v2421_v34, %v2425_v39  ;;  %v2321_v24 = vunpack.i.h.bf16 %v3654_v49 }
 0x334   :  { %v2517_v2 = vpack.i.bf16 %v1209_v25, %v1347_v36 }
 0x335   :  { %2523 = vrot.lane.b32.xlu0 %v2522_v17, %s2722_s24  ;;  %2493 = vrot.lane.b32.xlu1 %v2492_v48, %s2722_s24  ;;  %v2335_v17 = vunpack.i.l.bf16 %v3667_v60 }
 0x336   :  { %2513 = vrot.lane.b32.xlu2 %v2512_v58, %s2722_s24 }
 0x337   :  { %v3774_v56 = vpop.permute.xlu1 %2448 }
 0x338   :  { %v3776_v21 = vpop.permute.xlu0 %2443  ;;  %v2451_v30 = vunpack.i.h.bf16 %v3774_v56 }
 0x339   :  { %v2446_v60 = vunpack.i.h.bf16 %v3776_v21  ;;  %v2445_v13 = vunpack.i.l.bf16 %v3776_v21 }
 0x33d   :  { %2503 = vrot.lane.b32.xlu1 %v2502_v18, %s2722_s24 }
 0x33e   :  { %2518 = vrot.lane.b32.xlu2 %v2517_v2, %s2722_s24 }
 0x33f   :  { %v3789_v16 = vpop.permute.xlu1 %2453 }
 0x340   :  { %v2464_v53 = vpop.permute.xlu0 %2463  ;;  %v2456_v8 = vunpack.i.h.bf16 %v3789_v16 }
 0x341   :  { %v2466_v3 = vunpack.i.h.bf16 %v2464_v53  ;;  %v2465_v61 = vunpack.i.l.bf16 %v2464_v53  ;;  %v2459_v53 = vpop.permute.xlu2 %2458 }
 0x343   :  { %v1411_v22 = vsel %vm829_vm1, %v2465_v61, %v2466_v3  ;;  %v1412_v10 = vsel %vm829_vm1, %v2466_v3, %v2320_v11  ;;  %v1410_v33 = vsel %vm829_vm1, %v2321_v24, %v2465_v61  ;;  %v2460_v3 = vunpack.i.l.bf16 %v2459_v53 }
 0x344   :  { %v2527_v34 = vpack.i.bf16 %v1412_v10, %v1411_v22  ;;  %v2441_v61 = vunpack.i.h.bf16 %v3753_v51  ;;  %v2341_v22 = vunpack.i.h.bf16 %v3650_v31  ;;  %v2461_v24 = vunpack.i.h.bf16 %v2459_v53 }
 0x345   :  { %v2346_v31 = vunpack.i.h.bf16 %v3656_v57  ;;  %v2430_v51 = vunpack.i.l.bf16 %v3711_v7  ;;  %v2455_v57 = vunpack.i.l.bf16 %v3789_v16 }
 0x346   :  { %2528 = vrot.lane.b32.xlu2 %v2527_v34, %s2722_s24  ;;  %v1269_v34 = vsel %vm683_vm0, %v2456_v8, %v2460_v3 }
 0x347   :  { %v2469_v29 = vpop.permute.xlu1 %2468 }
 0x348   :  { %v2474_v58 = vpop.permute.xlu0 %2473  ;;  %v2471_v48 = vunpack.i.h.bf16 %v2469_v29  ;;  %v2470_v0 = vunpack.i.l.bf16 %v2469_v29 }
 0x349   :  { %v2476_v43 = vunpack.i.h.bf16 %v2474_v58  ;;  %v2475_v15 = vunpack.i.l.bf16 %v2474_v58  ;;  %v1290_v58 = vsel %vm361_vm10, %v2430_v51, %v2431_v55 }
 0x34a   :  { %v1351_v19 = vsel %vm767_vm3, %v2470_v0, %v2471_v48  ;;  %v1352_v9 = vsel %vm767_vm3, %v2471_v48, %v2330_v14  ;;  %v1350_v49 = vsel %vm767_vm3, %v2331_v32, %v2470_v0  ;;  %v1292_v32 = vsel %vm361_vm10, %v2440_v20, %v2441_v61 }
 0x34b   :  { %v1321_v25 = vsel %vm736_vm2, %v2475_v15, %v2476_v43  ;;  %v1322_v18 = vsel %vm736_vm2, %v2476_v43, %v2335_v17  ;;  %v2532_v36 = vpack.i.bf16 %v1351_v19, %v1410_v33  ;;  %v2537_v2 = vpack.i.bf16 %v1380_v35, %v1352_v9 }
 0x34c   :  { %v2542_v41 = vpack.i.bf16 %v1322_v18, %v1321_v25  ;;  %v2547_v11 = vpack.i.bf16 %v1408_v27, %v1350_v49  ;;  %v1320_v10 = vsel %vm736_vm2, %v2336_v45, %v2475_v15  ;;  %v1407_v14 = vsel %vm829_vm1, %v2341_v22, %v2405_v4 }
 0x34d   :  { %2533 = vrot.lane.b32.xlu1 %v2532_v36, %s2722_s24  ;;  %v2552_v5 = vpack.i.bf16 %v1320_v10, %v1292_v32  ;;  %v2557_v29 = vpack.i.bf16 %v1269_v34, %v1407_v14  ;;  %v2450_v17 = vunpack.i.l.bf16 %v3774_v56  ;;  %v1270_v20 = vsel %vm683_vm0, %v2460_v3, %v2461_v24 }
 0x34e   :  { %2543 = vrot.lane.b32.xlu0 %v2542_v41, %s2722_s24  ;;  %2538 = vrot.lane.b32.xlu2 %v2537_v2, %s2722_s24  ;;  %v1377_v48 = vsel %vm798_vm15, %v2346_v31, %v2380_v52  ;;  %v2562_v0 = vpack.i.bf16 %v1290_v58, %v1270_v20  ;;  %v1268_v52 = vsel %vm683_vm0, %v2455_v57, %v2456_v8 }
 0x34f   :  { %v1239_v4 = vsel %vm652_vm11, %v2446_v60, %v2450_v17  ;;  %v1240_v62 = vsel %vm652_vm11, %v2450_v17, %v2451_v30 }
 0x350   :  { %v2567_v43 = vpack.i.bf16 %v1239_v4, %v1377_v48  ;;  %v2592_v38 = vpack.i.bf16 %v1268_v52, %v1240_v62 }
 0x355   :  { %2548 = vrot.lane.b32.xlu1 %v2547_v11, %s2722_s24 }
 0x356   :  { %2553 = vrot.lane.b32.xlu0 %v2552_v5, %s2722_s24  ;;  %2558 = vrot.lane.b32.xlu2 %v2557_v29, %s2722_s24 }
 0x35d   :  { %2583 = vrot.lane.b32.xlu1 %v2582_v28, %s2722_s24  ;;  %v1238_v28 = vsel %vm652_vm11, %v2445_v13, %v2446_v60 }
 0x35e   :  { %2563 = vrot.lane.b32.xlu0 %v2562_v0, %s2722_s24  ;;  %2568 = vrot.lane.b32.xlu2 %v2567_v43, %s2722_s24 }
 0x365   :  { %2608 = vrot.lane.b32.xlu1 %v2607_v37, %s2722_s24  ;;  %v1210_v37 = vsel %vm446_vm9, %v2425_v39, %v2426_v26 }
 0x366   :  { %2573 = vrot.lane.b32.xlu2 %v2572_v59, %s2722_s24  ;;  %2578 = vrot.lane.b32.xlu0 %v2577_v6, %s2722_s24  ;;  %v2597_v63 = vpack.i.bf16 %v1238_v28, %v1210_v37 }
 0x36e   :  { %2593 = vrot.lane.b32.xlu0 %v2592_v38, %s2722_s24  ;;  %2588 = vrot.lane.b32.xlu2 %v2587_v54, %s2722_s24 }
 0x36f   :  { %v3881_v7 = vpop.permute.xlu1 %2478 }
 0x370   :  { %v2481_v8 = vunpack.i.h.bf16 %v3881_v7  ;;  %v2480_v45 = vunpack.i.l.bf16 %v3881_v7 }
 0x372   :  { %v1560_v30 = vsel %vm574_vm14, %v2480_v45, %v2481_v8 }
 0x376   :  { %2598 = vrot.lane.b32.xlu0 %v2597_v63, %s2722_s24 }
 0x37e   :  { %2603 = vrot.lane.b32.xlu0 %v2602_v44, %s2722_s24 }
 0x388   :  { %v3877_v47 = vpop.permute.xlu2 %2498 }
 0x389   :  { %v2500_v52 = vunpack.i.l.bf16 %v3877_v47 }
 0x390   :  { %v3879_v59 = vpop.permute.xlu2 %2513  ;;  %v3885_v1 = vpop.permute.xlu1 %2483 }
 0x391   :  { %v2515_v3 = vunpack.i.l.bf16 %v3879_v59  ;;  %v2516_v5 = vunpack.i.h.bf16 %v3879_v59  ;;  %v2486_v62 = vunpack.i.h.bf16 %v3885_v1  ;;  %v2485_v13 = vunpack.i.l.bf16 %v3885_v1 }
 0x398   :  { %v3883_v46 = vpop.permute.xlu2 %2518 }
 0x399   :  { %v2520_v0 = vunpack.i.l.bf16 %v3883_v46 }
 0x39f   :  { %v2509_v23 = vpop.permute.xlu0 %2508  ;;  %v3887_v39 = vpop.permute.xlu1 %2488 }
 0x3a0   :  { %v2529_v50 = vpop.permute.xlu2 %2528  ;;  %v2511_v6 = vunpack.i.h.bf16 %v2509_v23  ;;  %v2510_v54 = vunpack.i.l.bf16 %v2509_v23  ;;  %v2491_v29 = vunpack.i.h.bf16 %v3887_v39  ;;  %v2490_v17 = vunpack.i.l.bf16 %v3887_v39 }
 0x3a1   :  { %v2531_v55 = vunpack.i.h.bf16 %v2529_v50  ;;  %v2530_v40 = vunpack.i.l.bf16 %v2529_v50 }
 0x3a2   :  { %v1562_v12 = vsel %vm574_vm14, %v2510_v54, %v2511_v6  ;;  %v1555_v28 = vsel %vm574_vm14, %v2520_v0, %v2490_v17  ;;  %v1556_v37 = vsel %vm574_vm14, %v2490_v17, %v2491_v29 }
 0x3a3   :  { %v1566_v42 = vsel %vm574_vm14, %v2530_v40, %v2531_v55 }
 0x3a4   :  { %1673 = vmatpush.msrb.mxu3 %v1566_v42  ;;  %v1548_v42 = vsel %vm574_vm14, %v2485_v13, %v2486_v62 }
 0x3a6   :  { %1674 = vmatpush.msrb.mxu3 %v1562_v12 }
 0x3a7   :  { %v3891_v44 = vpop.permute.xlu1 %2493  ;;  %v3897_v15 = vpop.permute.xlu0 %2523 }
 0x3a8   :  { %v2539_v56 = vpop.permute.xlu2 %2538  ;;  %v2495_v4 = vunpack.i.l.bf16 %v3891_v44  ;;  %v2496_v43 = vunpack.i.h.bf16 %v3891_v44  ;;  %v2526_v17 = vunpack.i.h.bf16 %v3897_v15 }
 0x3a9   :  { %v2541_v27 = vunpack.i.h.bf16 %v2539_v56  ;;  %v2540_v19 = vunpack.i.l.bf16 %v2539_v56 }
 0x3aa   :  { %v1551_v59 = vsel %vm574_vm14, %v2500_v52, %v2495_v4  ;;  %v1552_v1 = vsel %vm574_vm14, %v2495_v4, %v2496_v43  ;;  %v2501_v4 = vunpack.i.h.bf16 %v3877_v47  ;;  %v43_v43 = vld [vmem:[#allocation6 + $0x8] sm:$0xff] }
 0x3ab   :  { %v1561_v41 = vsel %vm574_vm14, %v2541_v27, %v2510_v54  ;;  %v2730_v27 = vmov 2  }
 0x3ac   :  { %2613 = vset.pattern.permute.xlu0 %v2730_v27 }
 0x3af   :  { %v3893_v21 = vpop.permute.xlu1 %2503 }
 0x3b0   :  { %v3895_v16 = vpop.permute.xlu2 %2558  ;;  %v2506_v7 = vunpack.i.h.bf16 %v3893_v21  ;;  %v2505_v23 = vunpack.i.l.bf16 %v3893_v21 }
 0x3b1   :  { %v2560_v22 = vunpack.i.l.bf16 %v3895_v16  ;;  %v2561_v54 = vunpack.i.h.bf16 %v3895_v16 }
 0x3b2   :  { %v1544_v21 = vsel %vm574_vm14, %v2505_v23, %v2506_v7 }
 0x3b8   :  { %v3899_v25 = vpop.permute.xlu2 %2568 }
 0x3b9   :  { %v2570_v10 = vunpack.i.l.bf16 %v3899_v25 }
 0x3bb   :  { %v1559_v57 = vsel %vm574_vm14, %v2570_v10, %v2480_v45 }
 0x3bf   :  { %v2534_v35 = vpop.permute.xlu1 %2533 }
 0x3c0   :  { %v2544_v33 = vpop.permute.xlu0 %2543  ;;  %v2536_v9 = vunpack.i.h.bf16 %v2534_v35  ;;  %v2535_v49 = vunpack.i.l.bf16 %v2534_v35  ;;  %v3917_v58 = vpop.permute.xlu2 %2573  ;;  %v45_v35 = vld [vmem:[#allocation6 + $0x10] ss:$0 sm:$0xff] }
 0x3c1   :  { %v2546_v18 = vunpack.i.h.bf16 %v2544_v33  ;;  %v2545_v36 = vunpack.i.l.bf16 %v2544_v33  ;;  %v2575_v26 = vunpack.i.l.bf16 %v3917_v58 }
 0x3c2   :  { %v1565_v2 = vsel %vm574_vm14, %v2535_v49, %v2530_v40  ;;  %v1558_v53 = vsel %vm574_vm14, %v2536_v9, %v2540_v19  ;;  %v2731_v19 = vmov 3  }
 0x3c3   :  { %1653 = vmatpush.msrb.mxu2 %v1565_v2  ;;  %1675 = vmatpush.msrb.mxu3 %v1558_v53  ;;  %v1554_v11 = vsel %vm574_vm14, %v2545_v36, %v2546_v18  ;;  %v1547_v39 = vsel %vm574_vm14, %v2575_v26, %v2485_v13 }
 0x3c4   :  { %2614 = vset.pattern.permute.xlu1 %v2731_v19 }
 0x3c5   :  { %1654 = vmatpush.msrb.mxu2 %v1561_v41  ;;  %1676 = vmatpush.msrb.mxu3 %v1554_v11 }
 0x3c6   :  { %1724 = vperm.xlu1 %2614, %v45_v35  }
 0x3c7   :  { %v2549_v61 = vpop.permute.xlu1 %2548 }
 0x3c8   :  { %v2554_v34 = vpop.permute.xlu0 %2553  ;;  %v2551_v32 = vunpack.i.h.bf16 %v2549_v61  ;;  %v2550_v14 = vunpack.i.l.bf16 %v2549_v61  ;;  %v2589_v16 = vpop.permute.xlu2 %2588 }
 0x3c9   :  { %v2556_v24 = vunpack.i.h.bf16 %v2554_v34  ;;  %v2555_v60 = vunpack.i.l.bf16 %v2554_v34  ;;  %v2591_v49 = vunpack.i.h.bf16 %v2589_v16  ;;  %v2590_v8 = vunpack.i.l.bf16 %v2589_v16 }
 0x3ca   :  { %v1563_v31 = vsel %vm574_vm14, %v2560_v22, %v2551_v32  ;;  %v1564_v51 = vsel %vm574_vm14, %v2551_v32, %v2515_v3  ;;  %v1557_v20 = vsel %vm574_vm14, %v2550_v14, %v2536_v9  ;;  %v2633_v9 = vld [vmem:[#allocation6 + $0x10] sm:$0xff]  ;;  %v2571_v34 = vunpack.i.h.bf16 %v3899_v25 }
 0x3cb   :  { %1613 = vmatpush.msrb.mxu0 %v1563_v31  ;;  %1633 = vmatpush.msrb.mxu1 %v1564_v51  ;;  %v1550_v48 = vsel %vm574_vm14, %v2516_v5, %v2555_v60  ;;  %v1553_v38 = vsel %vm574_vm14, %v2556_v24, %v2545_v36  ;;  %v2732_v36 = vmov 1   ;;  %v2521_v24 = vunpack.i.h.bf16 %v3883_v46 }
 0x3cc   :  { %1655 = vmatpush.msrb.mxu2 %v1557_v20  ;;  %1677 = vmatpush.msrb.mxu3 %v1550_v48  ;;  %v2525_v31 = vunpack.i.l.bf16 %v3897_v15  ;;  %v2576_v25 = vunpack.i.h.bf16 %v3917_v58 }
 0x3cd   :  { %1614 = vmatpush.msrb.mxu0 %v1559_v57  ;;  %1634 = vmatpush.msrb.mxu1 %v1560_v30  ;;  %v1537_v46 = vsel %vm574_vm14, %v2526_v17, %v2521_v24 }
 0x3ce   :  { %1656 = vmatpush.msrb.mxu2 %v1553_v38  ;;  %1691 = vperm.xlu0 %2613, %v2633_v9   ;;  %v1534_v57 = vsel %vm574_vm14, %v2501_v4, %v2525_v31  ;;  %v1533_v15 = vsel %vm574_vm14, %v2576_v25, %v2501_v4 }
 0x3cf   :  { %v2584_v63 = vpop.permute.xlu1 %2583  ;;  %1615 = vmatpush.msrb.mxu0 %v1555_v28  ;;  %1635 = vmatpush.msrb.mxu1 %v1556_v37 }
 0x3d0   :  { %v2564_v50 = vpop.permute.xlu0 %2563  ;;  %v2585_v6 = vunpack.i.l.bf16 %v2584_v63  ;;  %2612 = vset.pattern.permute.xlu2 %v2732_v36  ;;  %v2586_v2 = vunpack.i.h.bf16 %v2584_v63 }
 0x3d1   :  { %v2566_v55 = vunpack.i.h.bf16 %v2564_v50  ;;  %v2565_v40 = vunpack.i.l.bf16 %v2564_v50  ;;  %1616 = vmatpush.msrb.mxu0 %v1551_v59  ;;  %1636 = vmatpush.msrb.mxu1 %v1552_v1 }
 0x3d2   :  { %v1543_v56 = vsel %vm574_vm14, %v2585_v6, %v2505_v23  ;;  %1414 = vperm.xlu2 %2612, %v2633_v9   ;;  %v1536_v22 = vsel %vm574_vm14, %v2586_v2, %v2590_v8 }
 0x3d3   :  { %1617 = vmatpush.msrb.mxu0 %v1547_v39  ;;  %1637 = vmatpush.msrb.mxu1 %v1548_v42  ;;  %v1549_v12 = vsel %vm574_vm14, %v2566_v55, %v2516_v5  ;;  %v1546_v44 = vsel %vm574_vm14, %v2561_v54, %v2565_v40 }
 0x3d4   :  { %1657 = vmatpush.msrb.mxu2 %v1549_v12  ;;  %1678 = vmatpush.msrb.mxu3 %v1546_v44 }
 0x3d5   :  { %1618 = vmatpush.msrb.mxu0 %v1543_v56  ;;  %1638 = vmatpush.msrb.mxu1 %v1544_v21 }
 0x3d6   :  { %2615 = vset.pattern.permute.xlu0 %v2731_v19 }
 0x3d7   :  { %v2609_v33 = vpop.permute.xlu1 %2608 }
 0x3d8   :  { %v2579_v18 = vpop.permute.xlu0 %2578  ;;  %v2610_v53 = vunpack.i.l.bf16 %v2609_v33  ;;  %v2611_v58 = vunpack.i.h.bf16 %v2609_v33 }
 0x3d9   :  { %v2581_v41 = vunpack.i.h.bf16 %v2579_v18  ;;  %v2580_v11 = vunpack.i.l.bf16 %v2579_v18 }
 0x3da   :  { %v1535_v61 = vsel %vm574_vm14, %v2610_v53, %v2586_v2 }
 0x3db   :  { %v1539_v45 = vsel %vm574_vm14, %v2591_v49, %v2580_v11  ;;  %v1540_v3 = vsel %vm574_vm14, %v2580_v11, %v2581_v41 }
 0x3dc   :  { %1619 = vmatpush.msrb.mxu0 %v1539_v45  ;;  %1639 = vmatpush.msrb.mxu1 %v1540_v3 }
 0x3de   :  { %1620 = vmatpush.msrb.mxu0 %v1535_v61  ;;  %1640 = vmatpush.msrb.mxu1 %v1536_v22 }
 0x3e0   :  { %v2594_v10 = vpop.permute.xlu0 %2593 }
 0x3e1   :  { %v2596_v32 = vunpack.i.h.bf16 %v2594_v10  ;;  %v2595_v14 = vunpack.i.l.bf16 %v2594_v10 }
 0x3e3   :  { %v1545_v5 = vsel %vm574_vm14, %v2596_v32, %v2561_v54  ;;  %v1542_v29 = vsel %vm574_vm14, %v2571_v34, %v2595_v14 }
 0x3e4   :  { %1658 = vmatpush.msrb.mxu2 %v1545_v5  ;;  %1679 = vmatpush.msrb.mxu3 %v1542_v29 }
 0x3e8   :  { %v2599_v60 = vpop.permute.xlu0 %2598 }
 0x3e9   :  { %v2601_v51 = vunpack.i.h.bf16 %v2599_v60  ;;  %v2600_v20 = vunpack.i.l.bf16 %v2599_v60 }
 0x3eb   :  { %v1541_v48 = vsel %vm574_vm14, %v2601_v51, %v2571_v34  ;;  %v1538_v0 = vsel %vm574_vm14, %v2521_v24, %v2600_v20 }
 0x3ec   :  { %1659 = vmatpush.msrb.mxu2 %v1541_v48  ;;  %1680 = vmatpush.msrb.mxu3 %v1538_v0 }
 0x3ee   :  { %1660 = vmatpush.msrb.mxu2 %v1537_v46  ;;  %1681 = vmatpush.msrb.mxu3 %v1534_v57 }
 0x3ef   :  { %1874 = vmatmul.msk.f32.vlgmr.msrb.gmra.mxu3 %vm1027_vm4, %v43_v43 }
 0x3f0   :  { %1661 = vmatpush.msrb.mxu2 %v1533_v15  ;;  %v2604_v47 = vpop.permute.xlu0 %2603 }
 0x3f1   :  { %v2606_v30 = vunpack.i.h.bf16 %v2604_v47  ;;  %v2605_v52 = vunpack.i.l.bf16 %v2604_v47  ;;  %1873 = vmatmul.msk.f32.vlgmr.msrb.gmra.mxu2 %vm1027_vm4, %v43_v43 }
 0x3f3   :  { %v1531_v62 = vsel %vm574_vm14, %v2611_v58, %v2605_v52  ;;  %v1532_v38 = vsel %vm574_vm14, %v2605_v52, %v2606_v30 }
 0x3f4   :  { %1621 = vmatpush.msrb.mxu0 %v1531_v62  ;;  %1641 = vmatpush.msrb.mxu1 %v1532_v38 }
 0x3f5   :  { %1871 = vmatmul.msk.f32.vlgmr.msrb.gmra.mxu0 %vm1027_vm4, %v43_v43  ;;  %1872 = vmatmul.msk.f32.vlgmr.msrb.gmra.mxu1 %vm1027_vm4, %v43_v43 }
 0x42c   :  { %v1415_v13 = vpop.permute.xlu2 %1414 }
 0x438   :  { %v1725_v61 = vpop.permute.xlu1 %1724 }
 0x440   :  { %v1692_v50 = vpop.permute.xlu0 %1691 }
 0x472   :  { %v1683_v26 = vpop.f32.mrf.mxu3  ;;  %v1623_v28 = vpop.f32.mrf.mxu0 }
 0x473   :  { %v1684_v37 = vadd.f32 %v1683_v26, %v1415_v13  ;;  %v1624_v63 = vadd.f32 %v1623_v28, %v1415_v13  ;;  %v1643_v59 = vpop.f32.mrf.mxu1 }
 0x474   :  { %v1644_v7 = vadd.f32 %v1643_v59, %v1415_v13  ;;  %v1663_v23 = vpop.f32.mrf.mxu2 }
 0x475   :  { %v1689_v6 = vmax.f32 %v1684_v37, 0.0  ;;  %v1686_v1 = vmax.f32 %v1624_v63, 0.0  ;;  %v1664_v54 = vadd.f32 %v1663_v23, %v1415_v13 }
 0x476   :  { %v1687_v55 = vmax.f32 %v1644_v7, 0.0 }
 0x477   :  { %v1688_v40 = vmax.f32 %v1664_v54, 0.0  ;;  %v1694_v39 = vmul.f32 %v1692_v50, %v1686_v1  ;;  %v1697_v42 = vmul.f32 %v1692_v50, %v1689_v6 }
 0x478   :  { %v1695_v12 = vmul.f32 %v1692_v50, %v1687_v55 }
 0x479   :  { %v1696_v44 = vmul.f32 %v1692_v50, %v1688_v40  ;;  %v1698_v56 = vrot.slane %v1694_v39, 4  ;;  %v1716_v21 = vrot.slane %v1697_v42, 4 }
 0x47a   :  { %v1704_v16 = vrot.slane %v1695_v12, 4 }
 0x47b   :  { %v1699_v35 = vadd.f32 %v1698_v56, %v1694_v39  ;;  %v1710_v27 = vrot.slane %v1696_v44, 4  ;;  %v1717_v19 = vadd.f32 %v1716_v21, %v1697_v42 }
 0x47c   :  { %v1705_v33 = vadd.f32 %v1704_v16, %v1695_v12 }
 0x47d   :  { %v1700_v9 = vrot.slane %v1699_v35, 2  ;;  %v1711_v49 = vadd.f32 %v1710_v27, %v1696_v44  ;;  %v1718_v18 = vrot.slane %v1717_v19, 2 }
 0x47e   :  { %v1706_v36 = vrot.slane %v1705_v33, 2 }
 0x47f   :  { %v1712_v2 = vrot.slane %v1711_v49, 2  ;;  %v1701_v53 = vadd.f32 %v1700_v9, %v1699_v35  ;;  %v1719_v41 = vadd.f32 %v1718_v18, %v1717_v19 }
 0x480   :  { %v1707_v11 = vadd.f32 %v1706_v36, %v1705_v33 }
 0x481   :  { %v1702_v8 = vrot.slane %v1701_v53, 1  ;;  %v1713_v45 = vadd.f32 %v1712_v2, %v1711_v49  ;;  %v1720_v3 = vrot.slane %v1719_v41, 1 }
 0x482   :  { %v1708_v22 = vrot.slane %v1707_v11, 1 }
 0x483   :  { %v1703_v10 = vadd.f32 %v1702_v8, %v1701_v53  ;;  %v1714_v34 = vrot.slane %v1713_v45, 1  ;;  %v1721_v32 = vadd.f32 %v1720_v3, %v1719_v41 }
 0x484   :  { %v1709_v14 = vadd.f32 %v1708_v22, %v1707_v11 }
 0x485   :  { %v1715_v5 = vadd.f32 %v1714_v34, %v1713_v45  ;;  %v1727_v29 = vadd.f32 %v1725_v61, %v1703_v10  ;;  %v1730_v24 = vadd.f32 %v1725_v61, %v1721_v32  ;;  %v4113_v32 = vld [vmem:[#allocation12_spill] sm:$0xff] }
 0x486   :  { %v1728_v60 = vadd.f32 %v1725_v61, %v1709_v14 }
 0x487   :  { %v1729_v17 = vadd.f32 %v1725_v61, %v1715_v5  ;;  %v1875_v31 = vmul.f32 -1.442695, %v1727_v29  ;;  %v1878_v20 = vmul.f32 -1.442695, %v1730_v24  ;;  %v4114_v29 = vld [vmem:[#allocation13_spill] sm:$0xff] }
 0x488   :  { %v1876_v51 = vmul.f32 -1.442695, %v1728_v60 }
 0x489   :  { %2616 = vpow2.f32 %v1875_v31  ;;  %v1877_v4 = vmul.f32 -1.442695, %v1729_v17 }
 0x48a   :  { %2618 = vpow2.f32 %v1876_v51 }
 0x48b   :  { %2620 = vpow2.f32 %v1877_v4 }
 0x48c   :  { %2622 = vpow2.f32 %v1878_v20 }
 0x48f   :  { %v2617_v25 = vpop.eup %2616 }
 0x490   :  { %v2619_v48 = vpop.eup %2618  ;;  %v1743_v0 = vadd.f32 1.0, %v2617_v25 }
 0x491   :  { %v2621_v43 = vpop.eup %2620  ;;  %v1744_v46 = vadd.f32 1.0, %v2619_v48 }
 0x492   :  { %v2623_v57 = vpop.eup %2622  ;;  %v1745_v15 = vadd.f32 1.0, %v2621_v43  ;;  %2624 = vrcp.f32 %v1743_v0  ;;  %v1756_v30 = vand.u32 2147483647, %v1743_v0  ;;  %vm1752_vm6 = vweird.f32 %v1743_v0 }
 0x493   :  { %v1746_v47 = vadd.f32 1.0, %v2623_v57  ;;  %2626 = vrcp.f32 %v1744_v46  ;;  %vm1767_vm5 = vweird.f32 %v1744_v46  ;;  %v1758_v63 = vand.u32 2147483648, %v1743_v0 }
 0x494   :  { %2628 = vrcp.f32 %v1745_v15  ;;  %v1771_v59 = vand.u32 2147483647, %v1744_v46  ;;  %vm3965_vm9 = vcmp.eq.f32.partialorder %v1756_v30, 8.507059e+37  ;;  %v1773_v6 = vand.u32 2147483648, %v1744_v46 }
 0x495   :  { %2630 = vrcp.f32 %v1746_v47  ;;  %vm1797_vm8 = vweird.f32 %v1746_v47  ;;  %v1786_v55 = vand.u32 2147483647, %v1745_v15  ;;  %v1788_v42 = vand.u32 2147483648, %v1745_v15 }
 0x496   :  { %v1803_v56 = vand.u32 2147483648, %v1746_v47  ;;  %v1801_v27 = vand.u32 2147483647, %v1746_v47  ;;  %v1759_v19 = vor.u32 1.1754944e-38, %v1758_v63  ;;  %v1774_v33 = vor.u32 1.1754944e-38, %v1773_v6 }
 0x497   :  { %vm1782_vm0 = vweird.f32 %v1745_v15  ;;  %vm1772_vm1 = vcmp.eq.f32.partialorder %v1771_v59, 8.507059e+37  ;;  %v1789_v41 = vor.u32 1.1754944e-38, %v1788_v42  ;;  %vm1787_vm4 = vcmp.eq.f32.partialorder %v1786_v55, 8.507059e+37 }
 0x498   :  { %v2625_v58 = vpop.eup %2624  ;;  %v1804_v11 = vor.u32 1.1754944e-38, %v1803_v56 }
 0x499   :  { %v2627_v52 = vpop.eup %2626  ;;  %v1748_v62 = vmul.f32 %v2625_v58, %v1743_v0  ;;  %vm1753_vm10 = vweird.f32 %v2625_v58 }
 0x49a   :  { %v2629_v38 = vpop.eup %2628  ;;  %v1763_v13 = vmul.f32 %v2627_v52, %v1744_v46  ;;  %vm1768_vm12 = vweird.f32 %v2627_v52  ;;  %vm3970_vm14 = vmor %vm1752_vm6, %vm1753_vm10 }
 0x49b   :  { %v2631_v26 = vpop.eup %2630  ;;  %v1749_v28 = vsub.f32 1.0, %v1748_v62  ;;  %v1778_v37 = vmul.f32 %v2629_v38, %v1745_v15  ;;  %vm1783_vm13 = vweird.f32 %v2629_v38  ;;  %vm1769_vm11 = vmor %vm1767_vm5, %vm1768_vm12  ;;  %vm1802_vm5 = vcmp.eq.f32.partialorder %v1801_v27, 8.507059e+37 }
 0x49c   :  { %v1764_v7 = vsub.f32 1.0, %v1763_v13  ;;  %v1793_v23 = vmul.f32 %v2631_v26, %v1746_v47  ;;  %vm1798_vm15 = vweird.f32 %v2631_v26  ;;  %vm1784_vm2 = vmor %vm1782_vm0, %vm1783_vm13 }
 0x49d   :  { %v1779_v1 = vsub.f32 1.0, %v1778_v37  ;;  %v1750_v54 = vmul.f32 %v2625_v58, %v1749_v28  ;;  %vm1799_vm3 = vmor %vm1797_vm8, %vm1798_vm15 }
 0x49e   :  { %v1765_v40 = vmul.f32 %v2627_v52, %v1764_v7  ;;  %v1794_v39 = vsub.f32 1.0, %v1793_v23 }
 0x49f   :  { %v1751_v12 = vadd.f32 %v2625_v58, %v1750_v54  ;;  %v1780_v44 = vmul.f32 %v2629_v38, %v1779_v1 }
 0x4a0   :  { %v1795_v21 = vmul.f32 %v2631_v26, %v1794_v39  ;;  %v1766_v35 = vadd.f32 %v2627_v52, %v1765_v40 }
 0x4a1   :  { %v1781_v9 = vadd.f32 %v2629_v38, %v1780_v44  ;;  %v1755_v49 = vsel %vm3970_vm14, %v2625_v58, %v1751_v12 }
 0x4a2   :  { %v1770_v18 = vsel %vm1769_vm11, %v2627_v52, %v1766_v35  ;;  %v1796_v36 = vadd.f32 %v2631_v26, %v1795_v21  ;;  %v1760_v3 = vsel %vm3965_vm9, %v1759_v19, %v1755_v49 }
 0x4a3   :  { %v1775_v2 = vsel %vm1772_vm1, %v1774_v33, %v1770_v18  ;;  %v1785_v53 = vsel %vm1784_vm2, %v2629_v38, %v1781_v9 }
 0x4a4   :  { %v1800_v8 = vsel %vm1799_vm3, %v2631_v26, %v1796_v36  ;;  %v1809_v45 = vrot.slane %v1775_v2, 4  ;;  %v1790_v61 = vsel %vm1787_vm4, %v1789_v41, %v1785_v53 }
 0x4a5   :  { %v1805_v22 = vsel %vm1802_vm5, %v1804_v11, %v1800_v8 }
 0x4a6   :  { %v1811_v10 = vsel %vm1810_vm7, %v1760_v3, %v1809_v45  ;;  %v1817_v34 = vrot.slane %v1805_v22, 4 }
 0x4a7   :  { %v1813_v14 = vmul.f32 %v1811_v10, %v4113_v32 }
 0x4a8   :  { %v1818_v5 = vsel %vm1810_vm7, %v1790_v61, %v1817_v34 }
 0x4a9   :  { %1814 = vst [vmem:[#allocation8] sm:$0xff] %v1813_v14  ;;  %v1820_v24 = vmul.f32 %v1818_v5, %v4114_v29 }
 0x4ab   :  { %1822 = vst [vmem:[#allocation8 + $0x8] sm:$0xff] %v1820_v24 }
 0x4ac   :  { %1835 = dma.vmem_to_hbm [thread:$0]  %s1828_s4, 256, %s1830_s7, [#allocation5], %s2713_s17, %s2713_s17, %s2714_s18  }
 0x4ad   :  { %2710 = dma.done.wait [#allocation5], 256  }
 0x4ae   :  { %2711 = vsyncadd [#allocation5], 4294967040 }
 0x4af   :  { %1840 = vsyncpa [#allocation4], 1 }
 0x4b0   :  { %1841 = vsyncpa [#allocation7], 1 }
 0x4b1   :  { %1842 = vsyncpa [#allocation5], 1 }

</bundles_post_ra>
